<compile_context>
chip_gen: v5e
topology: v5e:2x2
jax: 0.10.0
libtpu: 0.0.40
codegen_flags: <defaults>
</compile_context>

<pallas_src>
import jax
import jax.numpy as jnp
from jax import lax
from jax.experimental import pallas as pl
from jax.experimental.pallas import tpu as pltpu


_VMEM_LIMIT_BYTES = 48 * 1024 * 1024      # fits v7x (64 MiB physical), > 32 MiB default
_TILE_BUDGET_BYTES = 20 * 1024 * 1024     # streamed (double-buffered) bytes per kernel


def _round_up(x, m):
    return ((x + m - 1) // m) * m


def _choose_tile(n, bytes_per_unit, budget=_TILE_BUDGET_BYTES, align=128, max_tile=8192):
    """Pick a tile along a streamed dim from a VMEM byte budget.

    Returns (tile, padded_extent).  If the whole extent fits it is used as-is
    (single step, no padding); otherwise the tile is a multiple of `align`.
    """
    if n * bytes_per_unit <= budget:
        return n, n
    t = min(max_tile, max(align, (budget // bytes_per_unit) // align * align))
    return t, _round_up(n, t)


# --------------------------- encoder conv kernel ------------------------------
# TODO(synk): the reference Encoder (VGG/ResNet backbone) is not provided in the
# snippet; a deterministic single 3x3 stride-2 conv + ReLU stands in for it.

def conv3x3_s2_relu(x, weight, bias):
    """x: [N, Cin, H, W] f32; weight: [Cout, Cin, 3, 3]; bias: [Cout].

    Returns (features, (Hf, Wf, We, Coutp)) with features laid out as
    [N, Hf*We, Coutp] bf16, where We = Wf + 1 (last column of every feature
    row is junk) and Coutp = Cout padded to 128 lanes (padded channels == 0).
    """
    N, Cin, H, W = x.shape
    Cout = weight.shape[0]
    Hf = (H - 1) // 2 + 1
    Wf = (W - 1) // 2 + 1
    He, We = Hf + 2, Wf + 1             # phase-plane extents
    Hp, Wp = 2 * He, 2 * We             # even padded input extents
    MR = Hf * We                        # output rows per image (incl. junk col)
    K = 9 * Cin
    Kp = _round_up(K, 32)
    Coutp = _round_up(Cout, 128)

    # Space-to-depth phases: phases[n, 2*pi+pj, a*We+b, c] = xpad[n, 2a+pi, 2b+pj, c].
    # Tap (i, j) of the stride-2 conv is then a *contiguous* row-slice of one
    # flattened phase plane (start = (i//2)*We + (j//2)), so the kernel builds
    # the im2col block from static slices + a lane concat -- no 9x patch
    # matrix through HBM.
    x_nhwc = jnp.transpose(x, (0, 2, 3, 1)).astype(jnp.float32)
    xp = jnp.pad(x_nhwc, ((0, 0), (1, Hp - H - 1), (1, Wp - W - 1), (0, 0)))
    phases = xp.reshape(N, He, 2, We, 2, Cin).transpose(0, 2, 4, 1, 3, 5)
    phases = phases.reshape(N, 4, He * We, Cin)

    w2 = jnp.transpose(weight, (2, 3, 1, 0)).reshape(K, Cout)         # (i, j, cin) x cout
    w2 = jnp.pad(w2, ((0, Kp - K), (0, Coutp - Cout))).astype(jnp.bfloat16)
    b2 = jnp.pad(bias.reshape(1, Cout), ((0, 0), (0, Coutp - Cout))).astype(jnp.float32)

    def kernel(x_ref, w_ref, b_ref, o_ref):
        # x_ref: (4, He*We, Cin) f32; w_ref: (Kp, Coutp) bf16; b_ref: (1, Coutp) f32
        taps = []
        for i in range(3):
            for j in range(3):
                p = (i % 2) * 2 + (j % 2)
                s = (i // 2) * We + (j // 2)
                taps.append(x_ref[p, s:s + MR, :])                    # (MR, Cin)
        if Kp > K:
            taps.append(jnp.zeros((MR, Kp - K), jnp.float32))
        patch = jnp.concatenate(taps, axis=-1).astype(jnp.bfloat16)   # (MR, Kp)
        acc = jnp.dot(patch, w_ref[...], preferred_element_type=jnp.float32)
        o_ref[...] = jnp.maximum(acc + b_ref[...], 0.0).astype(o_ref.dtype)  # bias+ReLU, bf16 store

    # TODO(synk): for very large feature maps, tile each image into output-row
    # strips (overlapping phase-row windows) instead of one image per grid step.
    out = pl.pallas_call(
        kernel,
        out_shape=jax.ShapeDtypeStruct((N, MR, Coutp), jnp.bfloat16),
        grid=(N,),
        in_specs=[pl.BlockSpec((None, 4, He * We, Cin), lambda n: (n, 0, 0, 0)),
                  pl.BlockSpec((Kp, Coutp), lambda n: (0, 0)),
                  pl.BlockSpec((1, Coutp), lambda n: (0, 0))],
        out_specs=pl.BlockSpec((None, MR, Coutp), lambda n: (n, 0, 0)),
        compiler_params=pltpu.CompilerParams(
            dimension_semantics=("parallel",),
            vmem_limit_bytes=_VMEM_LIMIT_BYTES),
    )(phases, w2, b2)
    return out, (Hf, Wf, We, Coutp)


# --------------------------- fused fg/bg masked pooling -----------------------

def masked_avg_pool_fgbg(fts, masks):
    """fts: [G, HW, C] bf16; masks: [G, 2, HW] f32 -> un-normalized sums [G, 2, C] f32."""
    G, HW, C = fts.shape
    Gt = min(4, max(1, G // 2)) if G > 1 else 1        # >= 2 parallel steps when possible
    Gp = _round_up(G, Gt)
    per_unit = 2 * (Gt * C * 2 + Gt * 2 * 4)           # double-buffered bytes / HW elem
    HWt, HWp = _choose_tile(HW, per_unit)
    if Gp != G or HWp != HW:
        fts = jnp.pad(fts, ((0, Gp - G), (0, HWp - HW), (0, 0)))
        masks = jnp.pad(masks, ((0, Gp - G), (0, 0), (0, HWp - HW)))

    def kernel(f_ref, m_ref, o_ref):
        @pl.when(pl.program_id(1) == 0)
        def _():
            o_ref[...] = jnp.zeros_like(o_ref)
        f = f_ref[...].astype(jnp.float32)             # bf16 stream, f32 math
        # Batched matmul over the HW tile -> MXU (no big VPU intermediate /
        # cross-lane reduce); fg and bg share one read of the feature tile.
        o_ref[...] += jnp.einsum('gkh,ghc->gkc', m_ref[...], f,
                                 preferred_element_type=jnp.float32)

    out = pl.pallas_call(
        kernel,
        out_shape=jax.ShapeDtypeStruct((Gp, 2, C), jnp.float32),
        grid=(Gp // Gt, HWp // HWt),                   # HW reduction axis last
        in_specs=[pl.BlockSpec((Gt, HWt, C), lambda g, h: (g, h, 0)),
                  pl.BlockSpec((Gt, 2, HWt), lambda g, h: (g, 0, h))],
        out_specs=pl.BlockSpec((Gt, 2, C), lambda g, h: (g, 0, 0)),
        compiler_params=pltpu.CompilerParams(
            dimension_semantics=("parallel", "arbitrary"),
            vmem_limit_bytes=_VMEM_LIMIT_BYTES),
    )(fts, masks)
    return out[:G]


# ------------------------------ cosine distance -------------------------------

def cosine_dist(protos, qfts, scaler=20.0, eps=1e-8):
    """protos: [B, P, C] f32; qfts: [B, L, C] bf16 -> [B, P, L] f32 scaled cosine sim."""
    B, P, C = protos.shape
    L = qfts.shape[1]
    per_unit = 2 * (C * 2 + P * 4)                     # double-buffered bytes / L elem
    Lt, Lp = _choose_tile(L, per_unit)
    if Lp != L:
        qfts = jnp.pad(qfts, ((0, 0), (0, Lp - L), (0, 0)))
    eps2 = eps * eps                                   # per-factor norm clamp

    def kernel(p_ref, f_ref, o_ref, sp_ref):
        @pl.when(pl.program_id(1) == 0)                # hoist proto norms per episode
        def _():
            p32 = p_ref[...]                                          # (1, P, C) f32
            nrm = jnp.sum(p32 * p32, axis=-1, keepdims=True)          # (1, P, 1)
            sp_ref[...] = scaler * lax.rsqrt(jnp.maximum(nrm, eps2))
        f = f_ref[...]                                                # (1, Lt, C) bf16
        dots = jnp.einsum('bpc,blc->bpl',
                          p_ref[...].astype(jnp.bfloat16), f,
                          preferred_element_type=jnp.float32)         # (1, P, Lt)
        f32 = f.astype(jnp.float32)
        inv_f = lax.rsqrt(jnp.maximum(jnp.sum(f32 * f32, axis=-1), eps2))  # (1, Lt)
        o_ref[...] = dots * sp_ref[...] * inv_f[:, None, :]

    out = pl.pallas_call(
        kernel,
        out_shape=jax.ShapeDtypeStruct((B, P, Lp), jnp.float32),
        grid=(B, Lp // Lt),
        in_specs=[pl.BlockSpec((1, P, C), lambda b, l: (b, 0, 0)),
                  pl.BlockSpec((1, Lt, C), lambda b, l: (b, l, 0))],
        out_specs=pl.BlockSpec((1, P, Lt), lambda b, l: (b, 0, l)),
        scratch_shapes=[pltpu.VMEM((1, P, 1), jnp.float32)],
        compiler_params=pltpu.CompilerParams(
            dimension_semantics=("parallel", "arbitrary"),
            vmem_limit_bytes=_VMEM_LIMIT_BYTES),
    )(protos, qfts)
    return out[:, :, :L]


# ------------------------------ glue / model ----------------------------------

def bilinear_matrix(dst, src):
    """Interpolation matrix [dst, src] matching F.interpolate(align_corners=True)."""
    if dst == 1 or src == 1:
        pos = jnp.zeros((dst,), jnp.float32)
    else:
        pos = jnp.arange(dst, dtype=jnp.float32) * (src - 1) / (dst - 1)
    lo = jnp.clip(jnp.floor(pos).astype(jnp.int32), 0, max(src - 2, 0))
    w = pos - lo.astype(jnp.float32)
    idx = jnp.arange(dst)
    mat = jnp.zeros((dst, src), jnp.float32)
    mat = mat.at[idx, lo].add(1.0 - w)
    mat = mat.at[idx, jnp.clip(lo + 1, 0, src - 1)].add(w)
    return mat


def fewshot_seg_forward(support_imgs, fore_mask, back_mask, qry_imgs, params):
    """
    support_imgs: [n_ways, n_shots, B, 3, H, W]
    fore_mask / back_mask: [n_ways, n_shots, B, H, W]
    qry_imgs: [n_queries, B, 3, H, W]
    returns: [n_queries * B, 1 + n_ways, H, W]
    """
    n_ways, n_shots, B, Cin, H, W = support_imgs.shape
    n_queries = qry_imgs.shape[0]
    G = n_ways * n_shots * B

    imgs_concat = jnp.concatenate(
        [support_imgs.reshape(G, Cin, H, W),
         qry_imgs.reshape(n_queries * B, Cin, H, W)], axis=0)

    fts, (Hf, Wf, We, Cp) = conv3x3_s2_relu(imgs_concat, params["w"], params["b"])
    HWe = Hf * We                                      # feature rows incl. junk column

    support_fts = fts[:G]                                              # [G, HWe, Cp] bf16
    qry_fts = fts[G:].reshape(n_queries, B, HWe, Cp)
    qry_fts = jnp.transpose(qry_fts, (1, 0, 2, 3)).reshape(B, n_queries * HWe, Cp)

    # Bilinear (align_corners=True) resampling matrices.  The reference upsamples
    # features to (H, W) before masked pooling; by linearity this equals pooling
    # at (Hf, Wf) against the resampled mask Lh^T @ m @ Lw, denominator = sum(m).
    Lh = bilinear_matrix(H, Hf)                                        # [H, Hf]
    Lw = bilinear_matrix(W, Wf)                                        # [W, Wf]

    fg = fore_mask.reshape(G, H, W).astype(jnp.float32)
    bg = back_mask.reshape(G, H, W).astype(jnp.float32)
    masks = jnp.stack([fg, bg], axis=1)                                # [G, 2, H, W]
    m_small = jnp.einsum('pa,qz,gkpq->gkaz', Lh, Lw, masks)            # [G, 2, Hf, Wf]
    m_small = jnp.pad(m_small, ((0, 0), (0, 0), (0, 0), (0, We - Wf)))  # zero junk col
    m_small = m_small.reshape(G, 2, HWe)
    den = masks.sum(axis=(2, 3))[..., None] + 1e-8                     # [G, 2, 1]

    pooled = masked_avg_pool_fgbg(support_fts, m_small) / den          # [G, 2, Cp]
    pooled = pooled.reshape(n_ways, n_shots, B, 2, Cp)
    fg_protos = jnp.mean(pooled[..., 0, :], axis=1)                    # [n_ways, B, Cp]
    bg_proto = jnp.mean(pooled[..., 1, :], axis=(0, 1))                # [B, Cp]
    protos = jnp.concatenate([bg_proto[:, None, :],
                              jnp.transpose(fg_protos, (1, 0, 2))], axis=1)  # [B, P, Cp]
    P = protos.shape[1]

    dist = cosine_dist(protos, qry_fts)                                # [B, P, Q*HWe]
    pred = dist.reshape(B, P, n_queries, Hf, We)[..., :Wf]             # drop junk column
    pred = jnp.transpose(pred, (2, 0, 1, 3, 4))                        # [Q, B, P, Hf, Wf]

    pred_up = jnp.einsum('pa,qz,nbkaz->nbkpq', Lh, Lw, pred)           # [Q, B, P, H, W]
    return pred_up.reshape(n_queries * B, P, H, W)


# ----------------------------------- main --------------------------------------

if __name__ == "__main__":
    key = jax.random.PRNGKey(0)
    n_ways, n_shots, n_queries = 2, 2, 1
    B, Cin, H, W = 2, 3, 16, 16
    C_feat = 32

    k1, k2, k3, k4, k5 = jax.random.split(key, 5)
    support_imgs = jax.random.normal(k1, (n_ways, n_shots, B, Cin, H, W), jnp.float32)
    qry_imgs = jax.random.normal(k2, (n_queries, B, Cin, H, W), jnp.float32)
    fore_mask = (jax.random.uniform(k3, (n_ways, n_shots, B, H, W)) > 0.5).astype(jnp.float32)
    back_mask = 1.0 - fore_mask

    # deterministic encoder parameters (synthetic, not a checkpoint)
    w = 0.1 * jax.random.normal(k4, (C_feat, Cin, 3, 3), jnp.float32)
    b = 0.01 * jax.random.normal(k5, (C_feat,), jnp.float32)
    params = {"w": w, "b": b}

    out = jax.jit(fewshot_seg_forward)(support_imgs, fore_mask, back_mask, qry_imgs, params)
    out = jax.block_until_ready(out)

    assert out.shape == (n_queries * B, n_ways + 1, H, W), out.shape
    assert bool(jnp.all(jnp.isfinite(out)))
    print("KERNEL_OK")
</pallas_src>

<mosaic_0001>
module attributes {stable_mosaic.version = 11 : i64} {
  func.func @kernel(%arg0: i32, %arg1: memref<1x4x90x3xf32, #tpu.memory_space<vmem>>, %arg2: memref<32x128xbf16, #tpu.memory_space<vmem>>, %arg3: memref<1x128xf32, #tpu.memory_space<vmem>>, %arg4: memref<1x72x128xbf16, #tpu.memory_space<vmem>>) attributes {dimension_semantics = [#tpu.dimension_semantics<parallel>], iteration_bounds = array<i64: 10>, scalar_prefetch = 0 : i64, scratch_operands = 0 : i64, tpu.core_type = #tpu.core_type<tc>, window_params = [{transform_indices = @transform_0, window_bounds = array<i64: 1, 4, 90, 3>}, {pipeline_mode = #tpu.pipeline_mode<synchronous>, transform_indices = @transform_1, window_bounds = array<i64: 32, 128>}, {pipeline_mode = #tpu.pipeline_mode<synchronous>, transform_indices = @transform_2, window_bounds = array<i64: 1, 128>}, {transform_indices = @transform_3, window_bounds = array<i64: 1, 72, 128>}]} {
    %c0 = arith.constant 0 : index
    %c0_0 = arith.constant 0 : index
    %c0_1 = arith.constant 0 : index
    %c0_2 = arith.constant 0 : index
    %0 = vector.load %arg1[%c0, %c0_0, %c0_1, %c0_2] : memref<1x4x90x3xf32, #tpu.memory_space<vmem>>, vector<1x1x72x3xf32>
    %1 = vector.shape_cast %0 : vector<1x1x72x3xf32> to vector<72x3xf32>
    %c0_3 = arith.constant 0 : index
    %c1 = arith.constant 1 : index
    %c0_4 = arith.constant 0 : index
    %c0_5 = arith.constant 0 : index
    %2 = vector.load %arg1[%c0_3, %c1, %c0_4, %c0_5] : memref<1x4x90x3xf32, #tpu.memory_space<vmem>>, vector<1x1x72x3xf32>
    %3 = vector.shape_cast %2 : vector<1x1x72x3xf32> to vector<72x3xf32>
    %c0_6 = arith.constant 0 : index
    %c0_7 = arith.constant 0 : index
    %c1_8 = arith.constant 1 : index
    %c0_9 = arith.constant 0 : index
    %4 = vector.load %arg1[%c0_6, %c0_7, %c1_8, %c0_9] : memref<1x4x90x3xf32, #tpu.memory_space<vmem>>, vector<1x1x72x3xf32>
    %5 = vector.shape_cast %4 : vector<1x1x72x3xf32> to vector<72x3xf32>
    %c0_10 = arith.constant 0 : index
    %c2 = arith.constant 2 : index
    %c0_11 = arith.constant 0 : index
    %c0_12 = arith.constant 0 : index
    %6 = vector.load %arg1[%c0_10, %c2, %c0_11, %c0_12] : memref<1x4x90x3xf32, #tpu.memory_space<vmem>>, vector<1x1x72x3xf32>
    %7 = vector.shape_cast %6 : vector<1x1x72x3xf32> to vector<72x3xf32>
    %c0_13 = arith.constant 0 : index
    %c3 = arith.constant 3 : index
    %c0_14 = arith.constant 0 : index
    %c0_15 = arith.constant 0 : index
    %8 = vector.load %arg1[%c0_13, %c3, %c0_14, %c0_15] : memref<1x4x90x3xf32, #tpu.memory_space<vmem>>, vector<1x1x72x3xf32>
    %9 = vector.shape_cast %8 : vector<1x1x72x3xf32> to vector<72x3xf32>
    %c0_16 = arith.constant 0 : index
    %c2_17 = arith.constant 2 : index
    %c1_18 = arith.constant 1 : index
    %c0_19 = arith.constant 0 : index
    %10 = vector.load %arg1[%c0_16, %c2_17, %c1_18, %c0_19] : memref<1x4x90x3xf32, #tpu.memory_space<vmem>>, vector<1x1x72x3xf32>
    %11 = vector.shape_cast %10 : vector<1x1x72x3xf32> to vector<72x3xf32>
    %c0_20 = arith.constant 0 : index
    %c0_21 = arith.constant 0 : index
    %c9 = arith.constant 9 : index
    %c0_22 = arith.constant 0 : index
    %12 = vector.load %arg1[%c0_20, %c0_21, %c9, %c0_22] : memref<1x4x90x3xf32, #tpu.memory_space<vmem>>, vector<1x1x72x3xf32>
    %13 = vector.shape_cast %12 : vector<1x1x72x3xf32> to vector<72x3xf32>
    %c0_23 = arith.constant 0 : index
    %c1_24 = arith.constant 1 : index
    %c9_25 = arith.constant 9 : index
    %c0_26 = arith.constant 0 : index
    %14 = vector.load %arg1[%c0_23, %c1_24, %c9_25, %c0_26] : memref<1x4x90x3xf32, #tpu.memory_space<vmem>>, vector<1x1x72x3xf32>
    %15 = vector.shape_cast %14 : vector<1x1x72x3xf32> to vector<72x3xf32>
    %c0_27 = arith.constant 0 : index
    %c0_28 = arith.constant 0 : index
    %c10 = arith.constant 10 : index
    %c0_29 = arith.constant 0 : index
    %16 = vector.load %arg1[%c0_27, %c0_28, %c10, %c0_29] : memref<1x4x90x3xf32, #tpu.memory_space<vmem>>, vector<1x1x72x3xf32>
    %17 = vector.shape_cast %16 : vector<1x1x72x3xf32> to vector<72x3xf32>
    %cst = arith.constant 0.000000e+00 : f32
    %18 = vector.broadcast %cst : f32 to vector<72x5xf32>
    %19 = tpu.concatenate %1, %3, %5, %7, %9, %11, %13, %15, %17, %18 in 1 : vector<72x3xf32>, vector<72x3xf32>, vector<72x3xf32>, vector<72x3xf32>, vector<72x3xf32>, vector<72x3xf32>, vector<72x3xf32>, vector<72x3xf32>, vector<72x3xf32>, vector<72x5xf32> -> vector<72x32xf32>
    %20 = arith.truncf %19 : vector<72x32xf32> to vector<72x32xbf16>
    %c0_30 = arith.constant 0 : index
    %c0_31 = arith.constant 0 : index
    %21 = vector.load %arg2[%c0_30, %c0_31] : memref<32x128xbf16, #tpu.memory_space<vmem>>, vector<32x128xbf16>
    %cst_32 = arith.constant dense<0.000000e+00> : vector<72x128xf32>
    %22 = tpu.matmul %20, %21, %cst_32 {dimension_numbers = #tpu.dot_dimension_numbers<[1], [0], [0], [1], [0, 0, 1, 1], [], []>} : vector<72x32xbf16>, vector<32x128xbf16>, vector<72x128xf32> -> vector<72x128xf32>
    %c0_33 = arith.constant 0 : index
    %c0_34 = arith.constant 0 : index
    %23 = vector.load %arg3[%c0_33, %c0_34] : memref<1x128xf32, #tpu.memory_space<vmem>>, vector<1x128xf32>
    %24 = vector.broadcast %23 : vector<1x128xf32> to vector<72x128xf32>
    %25 = arith.addf %22, %24 : vector<72x128xf32>
    %cst_35 = arith.constant 0.000000e+00 : f32
    %26 = vector.broadcast %cst_35 : f32 to vector<72x128xf32>
    %27 = arith.maximumf %25, %26 : vector<72x128xf32>
    %28 = arith.truncf %27 : vector<72x128xf32> to vector<72x128xbf16>
    %c0_36 = arith.constant 0 : index
    %c0_37 = arith.constant 0 : index
    %c0_38 = arith.constant 0 : index
    %29 = vector.load %arg4[%c0_36, %c0_37, %c0_38] : memref<1x72x128xbf16, #tpu.memory_space<vmem>>, vector<1x72x128xbf16>
    %30 = vector.shape_cast %29 : vector<1x72x128xbf16> to vector<72x128xbf16>
    %31 = vector.shape_cast %28 : vector<72x128xbf16> to vector<1x72x128xbf16>
    tpu.vector_store %arg4[%c0_36, %c0_37, %c0_38], %31 {strides = array<i32>} : memref<1x72x128xbf16, #tpu.memory_space<vmem>>, vector<1x72x128xbf16>,
    return
  }
  func.func @transform_0(%arg0: i32) -> (i32, i32, i32, i32) {
    %c0_i32 = arith.constant 0 : i32
    %c0_i32_0 = arith.constant 0 : i32
    %c0_i32_1 = arith.constant 0 : i32
    %c0_i32_2 = arith.constant 0 : i32
    return %arg0, %c0_i32, %c0_i32_0, %c0_i32_1 : i32, i32, i32, i32
  }
  func.func @transform_1(%arg0: i32) -> (i32, i32) {
    %c0_i32 = arith.constant 0 : i32
    %c0_i32_0 = arith.constant 0 : i32
    %c0_i32_1 = arith.constant 0 : i32
    return %c0_i32, %c0_i32_0 : i32, i32
  }
  func.func @transform_2(%arg0: i32) -> (i32, i32) {
    %c0_i32 = arith.constant 0 : i32
    %c0_i32_0 = arith.constant 0 : i32
    %c0_i32_1 = arith.constant 0 : i32
    return %c0_i32, %c0_i32_0 : i32, i32
  }
  func.func @transform_3(%arg0: i32) -> (i32, i32, i32) {
    %c0_i32 = arith.constant 0 : i32
    %c0_i32_0 = arith.constant 0 : i32
    %c0_i32_1 = arith.constant 0 : i32
    return %arg0, %c0_i32, %c0_i32_0 : i32, i32, i32
  }
}

module attributes {stable_mosaic.version = 11 : i64} {
  func.func @kernel(%arg0: i32, %arg1: i32, %arg2: memref<4x72x128xbf16, #tpu.memory_space<vmem>>, %arg3: memref<4x2x72xf32, #tpu.memory_space<vmem>>, %arg4: memref<4x2x128xf32, #tpu.memory_space<vmem>>) attributes {dimension_semantics = [#tpu.dimension_semantics<parallel>, #tpu.dimension_semantics<arbitrary>], iteration_bounds = array<i64: 2, 1>, scalar_prefetch = 0 : i64, scratch_operands = 0 : i64, tpu.core_type = #tpu.core_type<tc>, window_params = [{transform_indices = @transform_0, window_bounds = array<i64: 4, 72, 128>}, {transform_indices = @transform_1, window_bounds = array<i64: 4, 2, 72>}, {transform_indices = @transform_2, window_bounds = array<i64: 4, 2, 128>}]} {
    %c0_i32 = arith.constant 0 : i32
    %0 = arith.cmpi eq, %arg1, %c0_i32 : i32
    %1 = arith.extui %0 : i1 to i32
    %c0_i32_0 = arith.constant 0 : i32
    %2 = arith.cmpi ne, %1, %c0_i32_0 : i32
    scf.if %2 {
      %cst_12 = arith.constant 0.000000e+00 : f32
      %10 = vector.broadcast %cst_12 : f32 to vector<4x2x128xf32>
      %c0_13 = arith.constant 0 : index
      %c0_14 = arith.constant 0 : index
      %c0_15 = arith.constant 0 : index
      %11 = vector.load %arg4[%c0_13, %c0_14, %c0_15] : memref<4x2x128xf32, #tpu.memory_space<vmem>>, vector<4x2x128xf32>
      tpu.vector_store %arg4[%c0_13, %c0_14, %c0_15], %10 {strides = array<i32>} : memref<4x2x128xf32, #tpu.memory_space<vmem>>, vector<4x2x128xf32>,
    } else {
    }
    %c0 = arith.constant 0 : index
    %c0_1 = arith.constant 0 : index
    %c0_2 = arith.constant 0 : index
    %3 = vector.load %arg2[%c0, %c0_1, %c0_2] : memref<4x72x128xbf16, #tpu.memory_space<vmem>>, vector<4x72x128xbf16>
    %4 = arith.extf %3 : vector<4x72x128xbf16> to vector<4x72x128xf32>
    %c0_3 = arith.constant 0 : index
    %c0_4 = arith.constant 0 : index
    %c0_5 = arith.constant 0 : index
    %5 = vector.load %arg4[%c0_3, %c0_4, %c0_5] : memref<4x2x128xf32, #tpu.memory_space<vmem>>, vector<4x2x128xf32>
    %c0_6 = arith.constant 0 : index
    %c0_7 = arith.constant 0 : index
    %c0_8 = arith.constant 0 : index
    %6 = vector.load %arg3[%c0_6, %c0_7, %c0_8] : memref<4x2x72xf32, #tpu.memory_space<vmem>>, vector<4x2x72xf32>
    "tpu.trace_start"() <{level = 10 : i32, message = "gkh,ghc->gkc"}> : () -> ()
    %cst = arith.constant dense<0.000000e+00> : vector<4x2x128xf32>
    %7 = tpu.matmul %6, %4, %cst {dimension_numbers = #tpu.dot_dimension_numbers<[2], [1], [1], [2], [0, 0, 0, 1, 1, 2], [0], [0]>} : vector<4x2x72xf32>, vector<4x72x128xf32>, vector<4x2x128xf32> -> vector<4x2x128xf32>
    "tpu.trace_stop"() : () -> ()
    %8 = arith.addf %5, %7 : vector<4x2x128xf32>
    %c0_9 = arith.constant 0 : index
    %c0_10 = arith.constant 0 : index
    %c0_11 = arith.constant 0 : index
    %9 = vector.load %arg4[%c0_9, %c0_10, %c0_11] : memref<4x2x128xf32, #tpu.memory_space<vmem>>, vector<4x2x128xf32>
    tpu.vector_store %arg4[%c0_9, %c0_10, %c0_11], %8 {strides = array<i32>} : memref<4x2x128xf32, #tpu.memory_space<vmem>>, vector<4x2x128xf32>,
    return
  }
  func.func @transform_0(%arg0: i32, %arg1: i32) -> (i32, i32, i32) {
    %c0_i32 = arith.constant 0 : i32
    %c0_i32_0 = arith.constant 0 : i32
    return %arg0, %arg1, %c0_i32 : i32, i32, i32
  }
  func.func @transform_1(%arg0: i32, %arg1: i32) -> (i32, i32, i32) {
    %c0_i32 = arith.constant 0 : i32
    %c0_i32_0 = arith.constant 0 : i32
    return %arg0, %c0_i32, %arg1 : i32, i32, i32
  }
  func.func @transform_2(%arg0: i32, %arg1: i32) -> (i32, i32, i32) {
    %c0_i32 = arith.constant 0 : i32
    %c0_i32_0 = arith.constant 0 : i32
    %c0_i32_1 = arith.constant 0 : i32
    return %arg0, %c0_i32, %c0_i32_0 : i32, i32, i32
  }
}

module attributes {stable_mosaic.version = 11 : i64} {
  func.func @kernel(%arg0: i32, %arg1: i32, %arg2: memref<1x3x128xf32, #tpu.memory_space<vmem>>, %arg3: memref<1x72x128xbf16, #tpu.memory_space<vmem>>, %arg4: memref<1x3x72xf32, #tpu.memory_space<vmem>>, %arg5: memref<1x3x1xf32, #tpu.memory_space<vmem>>) attributes {dimension_semantics = [#tpu.dimension_semantics<parallel>, #tpu.dimension_semantics<arbitrary>], iteration_bounds = array<i64: 2, 1>, scalar_prefetch = 0 : i64, scratch_operands = 1 : i64, tpu.core_type = #tpu.core_type<tc>, window_params = [{transform_indices = @transform_0, window_bounds = array<i64: 1, 3, 128>}, {transform_indices = @transform_1, window_bounds = array<i64: 1, 72, 128>}, {transform_indices = @transform_2, window_bounds = array<i64: 1, 3, 72>}]} {
    %c0_i32 = arith.constant 0 : i32
    %0 = arith.cmpi eq, %arg1, %c0_i32 : i32
    %1 = arith.extui %0 : i1 to i32
    %c0_i32_0 = arith.constant 0 : i32
    %2 = arith.cmpi ne, %1, %c0_i32_0 : i32
    scf.if %2 {
      %c0_14 = arith.constant 0 : index
      %c0_15 = arith.constant 0 : index
      %c0_16 = arith.constant 0 : index
      %20 = vector.load %arg2[%c0_14, %c0_15, %c0_16] : memref<1x3x128xf32, #tpu.memory_space<vmem>>, vector<1x3x128xf32>
      %21 = arith.mulf %20, %20 : vector<1x3x128xf32>
      %cst_17 = arith.constant dense<0.000000e+00> : vector<1x3xf32>
      %22 = vector.multi_reduction <add>, %21, %cst_17 [2] : vector<1x3x128xf32> to vector<1x3xf32>
      %23 = vector.shape_cast %22 : vector<1x3xf32> to vector<1x3x1xf32>
      %cst_18 = arith.constant 1.000000e-16 : f32
      %24 = vector.broadcast %cst_18 : f32 to vector<1x3x1xf32>
      %25 = arith.maximumf %23, %24 : vector<1x3x1xf32>
      %26 = math.rsqrt %25 : vector<1x3x1xf32>
      %cst_19 = arith.constant 2.000000e+01 : f32
      %27 = vector.broadcast %cst_19 : f32 to vector<1x3x1xf32>
      %28 = arith.mulf %27, %26 : vector<1x3x1xf32>
      %c0_20 = arith.constant 0 : index
      %c0_21 = arith.constant 0 : index
      %c0_22 = arith.constant 0 : index
      %29 = vector.load %arg5[%c0_20, %c0_21, %c0_22] : memref<1x3x1xf32, #tpu.memory_space<vmem>>, vector<1x3x1xf32>
      tpu.vector_store %arg5[%c0_20, %c0_21, %c0_22], %28 {strides = array<i32>} : memref<1x3x1xf32, #tpu.memory_space<vmem>>, vector<1x3x1xf32>,
    } else {
    }
    %c0 = arith.constant 0 : index
    %c0_1 = arith.constant 0 : index
    %c0_2 = arith.constant 0 : index
    %3 = vector.load %arg3[%c0, %c0_1, %c0_2] : memref<1x72x128xbf16, #tpu.memory_space<vmem>>, vector<1x72x128xbf16>
    %c0_3 = arith.constant 0 : index
    %c0_4 = arith.constant 0 : index
    %c0_5 = arith.constant 0 : index
    %4 = vector.load %arg2[%c0_3, %c0_4, %c0_5] : memref<1x3x128xf32, #tpu.memory_space<vmem>>, vector<1x3x128xf32>
    %5 = arith.truncf %4 : vector<1x3x128xf32> to vector<1x3x128xbf16>
    "tpu.trace_start"() <{level = 10 : i32, message = "bpc,blc->bpl"}> : () -> ()
    %cst = arith.constant dense<0.000000e+00> : vector<1x3x72xf32>
    %6 = tpu.matmul %5, %3, %cst {dimension_numbers = #tpu.dot_dimension_numbers<[2], [2], [1], [1], [0, 0, 0, 1, 1, 1], [0], [0]>} : vector<1x3x128xbf16>, vector<1x72x128xbf16>, vector<1x3x72xf32> -> vector<1x3x72xf32>
    "tpu.trace_stop"() : () -> ()
    %7 = arith.extf %3 : vector<1x72x128xbf16> to vector<1x72x128xf32>
    %8 = arith.mulf %7, %7 : vector<1x72x128xf32>
    %cst_6 = arith.constant dense<0.000000e+00> : vector<1x72xf32>
    %9 = vector.multi_reduction <add>, %8, %cst_6 [2] : vector<1x72x128xf32> to vector<1x72xf32>
    %cst_7 = arith.constant 1.000000e-16 : f32
    %10 = vector.broadcast %cst_7 : f32 to vector<1x72xf32>
    %11 = arith.maximumf %9, %10 : vector<1x72xf32>
    %12 = math.rsqrt %11 : vector<1x72xf32>
    %c0_8 = arith.constant 0 : index
    %c0_9 = arith.constant 0 : index
    %c0_10 = arith.constant 0 : index
    %13 = vector.load %arg5[%c0_8, %c0_9, %c0_10] : memref<1x3x1xf32, #tpu.memory_space<vmem>>, vector<1x3x1xf32>
    %14 = vector.broadcast %13 : vector<1x3x1xf32> to vector<1x3x72xf32>
    %15 = arith.mulf %6, %14 : vector<1x3x72xf32>
    %16 = vector.shape_cast %12 : vector<1x72xf32> to vector<1x1x72xf32>
    %17 = vector.broadcast %16 : vector<1x1x72xf32> to vector<1x3x72xf32>
    %18 = arith.mulf %15, %17 : vector<1x3x72xf32>
    %c0_11 = arith.constant 0 : index
    %c0_12 = arith.constant 0 : index
    %c0_13 = arith.constant 0 : index
    %19 = vector.load %arg4[%c0_11, %c0_12, %c0_13] : memref<1x3x72xf32, #tpu.memory_space<vmem>>, vector<1x3x72xf32>
    tpu.vector_store %arg4[%c0_11, %c0_12, %c0_13], %18 {strides = array<i32>} : memref<1x3x72xf32, #tpu.memory_space<vmem>>, vector<1x3x72xf32>,
    return
  }
  func.func @transform_0(%arg0: i32, %arg1: i32) -> (i32, i32, i32) {
    %c0_i32 = arith.constant 0 : i32
    %c0_i32_0 = arith.constant 0 : i32
    %c0_i32_1 = arith.constant 0 : i32
    return %arg0, %c0_i32, %c0_i32_0 : i32, i32, i32
  }
  func.func @transform_1(%arg0: i32, %arg1: i32) -> (i32, i32, i32) {
    %c0_i32 = arith.constant 0 : i32
    %c0_i32_0 = arith.constant 0 : i32
    return %arg0, %arg1, %c0_i32 : i32, i32, i32
  }
  func.func @transform_2(%arg0: i32, %arg1: i32) -> (i32, i32, i32) {
    %c0_i32 = arith.constant 0 : i32
    %c0_i32_0 = arith.constant 0 : i32
    return %arg0, %c0_i32, %arg1 : i32, i32, i32
  }
}

</mosaic_0001>

<bundles_post_ra>
// kernel: fewshot_seg_forward.3
= control target key start
LH: loop header
LB: loop body
LE: loop exit
PB: predicated region body
PF: predicated region fallthrough
CT: control target
= control target key end

     0   :  { %s1087_s12 = smov 0   ;;  %s1362_s0 = inlined_call_operand.vmem [shape: f32[10,4,90,3], index: 0, kind: input, shape index: {}]   ;;  %s1363_s1 = inlined_call_operand.vmem [shape: bf16[32,128], index: 1, kind: input, shape index: {}]   ;;  %s1364_s2 = inlined_call_operand.vmem [shape: f32[1,128], index: 2, kind: input, shape index: {}]   ;;  %s1365_s3 = inlined_call_operand.vmem [shape: bf16[10,72,128], index: 3, kind: output, shape index: {}]  }
   0x1 LB: > { %s774_s13 = sadd.s32 4294967295, %s1057_s12   ;;  %p778_p0 = scmp.ge.s32.totalorder %s1057_s12, 1  ;;  %s1057_s12 = sphi %s1087_s12, %s13_s12  }
   0x2   : > { %p137_p1 = scmp.lt.s32.totalorder %s1057_s12, 11 }
   0x4   : > { %p138_p2 = pnand %p778_p0, %p137_p1 }
   0x5   : > { %p161_p3 = scmp.lt.s32.totalorder (!%p138_p2), %s774_s13, 9  ;;  %s1059_s18 = smov (!%p138_p2), 12  }
   0x6   : > { %141 = sbr.rel (%p138_p2) target bundleno = 383 (0x17f), region = 32  ;;  %s1060_s19 = smov (!%p138_p2), 6  }
   0x7   : > { %s1061_s20 = smov (!%p138_p2), 3   ;;  %s1062_s21 = smov (!%p138_p2), 15  }
   0x8   : > { %s1063_s22 = smov (!%p138_p2), 9   ;;  %s1064_s23 = smov (!%p138_p2), 24  }
   0x9   : > { %s1065_s24 = smov (!%p138_p2), 21   ;;  %s1066_s25 = smov (!%p138_p2), 18  }
   0xb   : > { %s1367_s13 = smov (!%p161_p3, %s774_s13), 9  ;;  %vm528_vm0 = vcmask 23552   ;;  %vm538_vm1 = vcmask 48128   ;;  %vm548_vm2 = vcmask 72704   ;;  %vm558_vm3 = vcmask 97280  }
   0xc   : > { %s872_s14 = smul.u32 384, %s1367_s13  ;;  %vm568_vm4 = vcmask 121856   ;;  %vm578_vm5 = vcmask 146432   ;;  %vm588_vm6 = vcmask 171008   ;;  %vm598_vm7 = vcmask 195584  }
   0xd   : > { %vm608_vm8 = vcmask 220160   ;;  %vm643_vm9 = vcmask 261120   ;;  %s873_s5 = smul.u32 36, %s1367_s13 }
   0xe   : > { %s1101_s17 = scalar_lea.vmem %s1362_s0, %s872_s14 }
   0xf   : > { %v803_v0 = vld [vmem:[%s1101_s17 + $0x140] sm:$0xff]  ;;  %v804_v1 = vld [vmem:[%s1101_s17 + $0x148] sm:$0xff]  ;;  %v244_v19 = vld [vmem:[%s1101_s17 + $0x32] sm:$0xff]  ;;  %s1352_s8 = scalar_lea.vmem %s1365_s3, %s873_s5 }
  0x10   : > { %v196_v2 = vld [vmem:[%s1101_s17 + $0x29] sm:$0xff]  ;;  %v910_v3 = vpack.i.bf16 %v804_v1, %v803_v0  ;;  %v1107_v4 = vld [vmem:[%s1101_s17 + $0x21] sm:$0xff]  ;;  %v822_v21 = vld [vmem:[%s1101_s17 + $0x91] sm:$0xff] }
  0x11   : > { %v900_v5 = vpack.i.bf16 %v196_v2, %v1107_v4  ;;  %v781_v6 = vld [vmem:[%s1101_s17 + $0x60] sm:$0xff]  ;;  %v782_v7 = vld [vmem:[%s1101_s17 + $0x68] sm:$0xff]  ;;  %v197_v22 = vld [vmem:[%s1101_s17 + $0x31] sm:$0xff] }
  0x12   : > { %911 = vrot.lane.b32.xlu2 %v910_v3, %s1059_s18  ;;  %v890_v8 = vpack.i.bf16 %v782_v7, %v781_v6  ;;  %v812_v9 = vld [vmem:[%s1101_s17 + $0xe1] sm:$0xff]  ;;  %v813_v10 = vld [vmem:[%s1101_s17 + $0xe9] sm:$0xff]  ;;  %v920_v25 = vpack.i.bf16 %v197_v22, %v196_v2  ;;  %v797_v27 = vld [vmem:[%s1101_s17 + $0xf8] sm:$0xff] }
  0x13   : > { %901 = vrot.lane.b32.xlu1 %v900_v5, %s1060_s19  ;;  %v794_v11 = vld [vmem:[%s1101_s17 + $0xe0] sm:$0xff]  ;;  %v795_v12 = vld [vmem:[%s1101_s17 + $0xe8] sm:$0xff]  ;;  %v915_v15 = vpack.i.bf16 %v813_v10, %v812_v9  ;;  %v796_v26 = vld [vmem:[%s1101_s17 + $0xf0] sm:$0xff] }
  0x14   : > { %891 = vrot.lane.b32.xlu0 %v890_v8, %s1061_s20  ;;  %v785_v13 = vld [vmem:[%s1101_s17 + $0x80] sm:$0xff]  ;;  %v786_v14 = vld [vmem:[%s1101_s17 + $0x88] sm:$0xff]  ;;  %v905_v16 = vpack.i.bf16 %v795_v12, %v794_v11  ;;  %v787_v29 = vld [vmem:[%s1101_s17 + $0x90] sm:$0xff]  ;;  %v945_v31 = vpack.i.bf16 %v797_v27, %v796_v26 }
  0x15   : > { %v895_v17 = vpack.i.bf16 %v786_v14, %v785_v13  ;;  %v243_v18 = vld [vmem:[%s1101_s17 + $0x2a] sm:$0xff]  ;;  %v198_v28 = vld [vmem:[%s1101_s17 + $0x39] sm:$0xff]  ;;  %v199_v34 = vld [vmem:[%s1101_s17 + $0x41] sm:$0xff] }
  0x16   : > { %v821_v20 = vld [vmem:[%s1101_s17 + $0x89] sm:$0xff]  ;;  %v930_v23 = vpack.i.bf16 %v244_v19, %v243_v18  ;;  %v788_v30 = vld [vmem:[%s1101_s17 + $0x98] sm:$0xff]  ;;  %v940_v32 = vpack.i.bf16 %v198_v28, %v197_v22  ;;  %v960_v39 = vpack.i.bf16 %v199_v34, %v198_v28  ;;  %v824_v43 = vld [vmem:[%s1101_s17 + $0xa1] sm:$0xff] }
  0x17   : > { %v925_v24 = vpack.i.bf16 %v822_v21, %v821_v20  ;;  %v935_v33 = vpack.i.bf16 %v788_v30, %v787_v29  ;;  %v814_v35 = vld [vmem:[%s1101_s17 + $0xf1] sm:$0xff]  ;;  %v815_v36 = vld [vmem:[%s1101_s17 + $0xf9] sm:$0xff]  ;;  %v246_v50 = vld [vmem:[%s1101_s17 + $0x42] sm:$0xff] }
  0x18   : > { %v805_v37 = vld [vmem:[%s1101_s17 + $0x150] sm:$0xff]  ;;  %v806_v38 = vld [vmem:[%s1101_s17 + $0x158] sm:$0xff]  ;;  %v955_v40 = vpack.i.bf16 %v815_v36, %v814_v35  ;;  %v789_v47 = vld [vmem:[%s1101_s17 + $0xa0] sm:$0xff] }
  0x19   : > { %v950_v41 = vpack.i.bf16 %v806_v38, %v805_v37  ;;  %v823_v42 = vld [vmem:[%s1101_s17 + $0x99] sm:$0xff]  ;;  %v783_v44 = vld [vmem:[%s1101_s17 + $0x70] sm:$0xff]  ;;  %v191_v53 = vld [vmem:[%s1101_s17 + $0x1] sm:$0xff] }
  0x1a   : > { %916 = vrot.lane.b32.xlu2 %v915_v15, %s1062_s21  ;;  %v784_v45 = vld [vmem:[%s1101_s17 + $0x78] sm:$0xff]  ;;  %v970_v46 = vpack.i.bf16 %v824_v43, %v823_v42  ;;  %v192_v54 = vld [vmem:[%s1101_s17 + $0x9] sm:$0xff]  ;;  %v790_v60 = vld [vmem:[%s1101_s17 + $0xc0] sm:$0xff] }
  0x1b   : > { %906 = vrot.lane.b32.xlu1 %v905_v16, %s1063_s22  ;;  %v965_v48 = vpack.i.bf16 %v784_v45, %v783_v44  ;;  %v245_v49 = vld [vmem:[%s1101_s17 + $0x3a] sm:$0xff]  ;;  %v193_v52 = vld [vmem:[%s1101_s17 + $0x11] sm:$0xff]  ;;  %v975_v57 = vpack.i.bf16 %v192_v54, %v191_v53  ;;  %v791_v61 = vld [vmem:[%s1101_s17 + $0xc8] sm:$0xff] }
  0x1c   : > { %896 = vrot.lane.b32.xlu0 %v895_v17, %s1061_s20  ;;  %v194_v51 = vld [vmem:[%s1101_s17 + $0x19] sm:$0xff]  ;;  %v985_v55 = vpack.i.bf16 %v246_v50, %v245_v49  ;;  %v792_v58 = vld [vmem:[%s1101_s17 + $0xd0] sm:$0xff]  ;;  %v990_v63 = vpack.i.bf16 %v791_v61, %v790_v60  ;;  %v800_v3 = vld [vmem:[%s1101_s17 + $0x128] sm:$0xff]  ;;  %v1020_v16 = vpack.i.bf16 %v193_v52, %v192_v54 }
  0x1d   : > { %v980_v56 = vpack.i.bf16 %v194_v51, %v193_v52  ;;  %v793_v59 = vld [vmem:[%s1101_s17 + $0xd8] sm:$0xff]  ;;  %v801_v0 = vld [vmem:[%s1101_s17 + $0x130] sm:$0xff]  ;;  %v799_v2 = vld [vmem:[%s1101_s17 + $0x120] sm:$0xff]  ;;  %v1025_v15 = vpack.i.bf16 %v1107_v4, %v194_v51 }
  0x1e   : > { %v995_v62 = vpack.i.bf16 %v793_v59, %v792_v58  ;;  %v802_v1 = vld [vmem:[%s1101_s17 + $0x138] sm:$0xff]  ;;  %v1000_v6 = vpack.i.bf16 %v800_v3, %v799_v2  ;;  %v798_v7 = vld [vmem:[%s1101_s17 + $0x100] sm:$0xff]  ;;  %v809_v11 = vld [vmem:[%s1101_s17 + $0xc9] sm:$0xff] }
  0x1f   : > { %v1005_v5 = vpack.i.bf16 %v802_v1, %v801_v0  ;;  %v810_v8 = vld [vmem:[%s1101_s17 + $0xd1] sm:$0xff]  ;;  %v811_v9 = vld [vmem:[%s1101_s17 + $0xd9] sm:$0xff]  ;;  %v808_v10 = vld [vmem:[%s1101_s17 + $0xc1] sm:$0xff] }
  0x20   : > { %v1015_v12 = vpack.i.bf16 %v811_v9, %v810_v8  ;;  %v1010_v13 = vpack.i.bf16 %v809_v11, %v808_v10  ;;  %v807_v14 = vld [vmem:[%s1101_s17 + $0x160] sm:$0xff]  ;;  %v817_v20 = vld [vmem:[%s1101_s17 + $0x69] sm:$0xff]  ;;  %v818_v21 = vld [vmem:[%s1101_s17 + $0x71] sm:$0xff] }
  0x21   : > { %v816_v17 = vld [vmem:[%s1101_s17 + $0x101] sm:$0xff]  ;;  %v819_v18 = vld [vmem:[%s1101_s17 + $0x79] sm:$0xff]  ;;  %v239_v27 = vld [vmem:[%s1101_s17 + $0xa] sm:$0xff] }
  0x22   : > { %931 = vrot.lane.b32.xlu2 %v930_v23, %s1064_s23  ;;  %v820_v19 = vld [vmem:[%s1101_s17 + $0x81] sm:$0xff]  ;;  %v1030_v23 = vpack.i.bf16 %v818_v21, %v817_v20  ;;  %v240_v28 = vld [vmem:[%s1101_s17 + $0x12] sm:$0xff] }
  0x23   : > { %926 = vrot.lane.b32.xlu1 %v925_v24, %s1065_s24  ;;  %v1035_v22 = vpack.i.bf16 %v820_v19, %v819_v18  ;;  %v229_v24 = vld [vmem:[%s1101_s17 + $0x49] sm:$0xff]  ;;  %v241_v4 = vld [vmem:[%s1101_s17 + $0x1a] sm:$0xff]  ;;  %v1040_v30 = vpack.i.bf16 %v240_v28, %v239_v27 }
  0x24   : > { %921 = vrot.lane.b32.xlu0 %v920_v25, %s1066_s25  ;;  %v242_v25 = vld [vmem:[%s1101_s17 + $0x22] sm:$0xff] }
  0x25   : > { %v1045_v29 = vpack.i.bf16 %v242_v25, %v241_v4  ;;  %v841_v35 = vld [vmem:[%s1363_s1] sm:$0xff]  ;;  %v177_v50 = vld [vmem:[%s1101_s17 + $0x28] sm:$0xff] }
  0x26   : > { %v176_v49 = vld [vmem:[%s1101_s17 + $0x20] sm:$0xff] }
  0x27   : > { %v180_v61 = vld [vmem:[%s1101_s17 + $0x40] sm:$0xff] }
  0x2a   : > { %946 = vrot.lane.b32.xlu2 %v945_v31, %s1063_s22  ;;  %v825_v31 = vld [vmem:[%s1101_s17 + $0xa9] sm:$0xff] }
  0x2b   : > { %941 = vrot.lane.b32.xlu1 %v940_v32, %s1060_s19 }
  0x2c   : > { %936 = vrot.lane.b32.xlu0 %v935_v33, %s1061_s20  ;;  %v842_v33 = vld [vmem:[%s1363_s1 + $0x8] sm:$0xff] }
  0x2d   : > { %867 = vmatpush.bf16.msra.mxu2 %v842_v33  ;;  %866 = vmatpush.bf16.msra.mxu1 %v842_v33 }
  0x2e   : > { %665 = vmatpush.bf16.msra.mxu0 %v842_v33  ;;  %868 = vmatpush.bf16.msra.mxu3 %v842_v33  ;;  %v179_v33 = vld [vmem:[%s1101_s17 + $0x38] sm:$0xff] }
  0x31   : > { %870 = vmatpush.bf16.msra.mxu2 %v841_v35  ;;  %869 = vmatpush.bf16.msra.mxu1 %v841_v35 }
  0x32   : > { %961 = vrot.lane.b32.xlu2 %v960_v39, %s1066_s25  ;;  %666 = vmatpush.bf16.msra.mxu0 %v841_v35 }
  0x33   : > { %956 = vrot.lane.b32.xlu1 %v955_v40, %s1062_s21  ;;  %871 = vmatpush.bf16.msra.mxu3 %v841_v35  ;;  %v172_v40 = vld [vmem:[%s1101_s17] sm:$0xff] }
  0x34   : > { %951 = vrot.lane.b32.xlu0 %v950_v41, %s1059_s18  ;;  %v173_v41 = vld [vmem:[%s1101_s17 + $0x8] sm:$0xff] }
  0x3a   : > { %273 = vrot.lane.b32.xlu2 %v789_v47, %s1061_s20 }
  0x3b   : > { %971 = vrot.lane.b32.xlu1 %v970_v46, %s1065_s24 }
  0x3c   : > { %966 = vrot.lane.b32.xlu0 %v965_v48, %s1061_s20 }
  0x42   : > { %986 = vrot.lane.b32.xlu2 %v985_v55, %s1064_s23 }
  0x43   : > { %981 = vrot.lane.b32.xlu1 %v980_v56, %s1060_s19 }
  0x44   : > { %976 = vrot.lane.b32.xlu0 %v975_v57, %s1060_s19 }
  0x4a   : > { %996 = vrot.lane.b32.xlu2 %v995_v62, %s1063_s22 }
  0x4b   : > { %991 = vrot.lane.b32.xlu1 %v990_v63, %s1063_s22 }
  0x4c   : > { %309 = vrot.lane.b32.xlu0 %v199_v34, %s1060_s19  ;;  %v247_v34 = vld [vmem:[%s1101_s17 + $0x4a] sm:$0xff] }
  0x52   : > { %1006 = vrot.lane.b32.xlu2 %v1005_v5, %s1059_s18 }
  0x53   : > { %1001 = vrot.lane.b32.xlu1 %v1000_v6, %s1059_s18 }
  0x54   : > { %345 = vrot.lane.b32.xlu0 %v798_v7, %s1063_s22 }
  0x5a   : > { %1016 = vrot.lane.b32.xlu2 %v1015_v12, %s1062_s21 }
  0x5b   : > { %1011 = vrot.lane.b32.xlu1 %v1010_v13, %s1062_s21 }
  0x5c   : > { %381 = vrot.lane.b32.xlu0 %v807_v14, %s1059_s18 }
  0x62   : > { %1026 = vrot.lane.b32.xlu2 %v1025_v15, %s1066_s25 }
  0x63   : > { %1021 = vrot.lane.b32.xlu1 %v1020_v16, %s1066_s25 }
  0x64   : > { %417 = vrot.lane.b32.xlu0 %v816_v17, %s1062_s21 }
  0x6a   : > { %1036 = vrot.lane.b32.xlu2 %v1035_v22, %s1065_s24 }
  0x6b   : > { %1031 = vrot.lane.b32.xlu1 %v1030_v23, %s1065_s24 }
  0x6c   : > { %445 = vrot.lane.b32.xlu0 %v229_v24, %s1066_s25  ;;  %v1203_v26 = vpop.permute.xlu2 %911 }
  0x6d   : > { %v914_v62 = vunpack.i.h.bf16 %v1203_v26  ;;  %v913_v63 = vunpack.i.l.bf16 %v1203_v26 }
  0x72   : > { %1046 = vrot.lane.b32.xlu2 %v1045_v29, %s1064_s23 }
  0x73   : > { %1041 = vrot.lane.b32.xlu1 %v1040_v30, %s1064_s23 }
  0x74   : > { %481 = vrot.lane.b32.xlu0 %v825_v31, %s1065_s24  ;;  %v1211_v32 = vpop.permute.xlu2 %916 }
  0x75   : > { %v919_v2 = vunpack.i.h.bf16 %v1211_v32  ;;  %v918_v3 = vunpack.i.l.bf16 %v1211_v32  ;;  %v178_v32 = vld [vmem:[%s1101_s17 + $0x30] sm:$0xff] }
  0x7c   : > { %517 = vrot.lane.b32.xlu0 %v247_v34, %s1064_s23  ;;  %v1221_v36 = vpop.permute.xlu2 %931 }
  0x7d   : > { %v934_v13 = vunpack.i.h.bf16 %v1221_v36  ;;  %v933_v14 = vunpack.i.l.bf16 %v1221_v36 }
  0x84   : > { %v1223_v37 = vpop.permute.xlu2 %946 }
  0x85   : > { %v902_v38 = vpop.permute.xlu1 %901 }
  0x86   : > { %v892_v39 = vpop.permute.xlu0 %891  ;;  %v904_v55 = vunpack.i.h.bf16 %v902_v38  ;;  %v903_v56 = vunpack.i.l.bf16 %v902_v38 }
  0x87   : > { %v894_v42 = vunpack.i.h.bf16 %v892_v39  ;;  %v893_v43 = vunpack.i.l.bf16 %v892_v39  ;;  %v949_v39 = vunpack.i.h.bf16 %v1223_v37 }
  0x89   : > { %v1228_v44 = vsel %vm528_vm0, %v172_v40, %v893_v43  ;;  %v1231_v45 = vsel %vm528_vm0, %v173_v41, %v894_v42  ;;  %v948_v40 = vunpack.i.l.bf16 %v1223_v37 }
  0x8c   : > { %v1233_v46 = vpop.permute.xlu2 %961 }
  0x8d   : > { %v907_v47 = vpop.permute.xlu1 %906 }
  0x8e   : > { %v897_v48 = vpop.permute.xlu0 %896  ;;  %v909_v51 = vunpack.i.h.bf16 %v907_v47  ;;  %v908_v52 = vunpack.i.l.bf16 %v907_v47 }
  0x8f   : > { %v899_v53 = vunpack.i.h.bf16 %v897_v48  ;;  %v898_v54 = vunpack.i.l.bf16 %v897_v48 }
  0x91   : > { %v533_v57 = vsel %vm528_vm0, %v176_v49, %v898_v54  ;;  %v534_v58 = vsel %vm528_vm0, %v177_v50, %v899_v53 }
  0x92   : > { %v543_v59 = vsel %vm538_vm1, %v533_v57, %v903_v56  ;;  %v544_v60 = vsel %vm538_vm1, %v534_v58, %v904_v55  ;;  %v964_v56 = vunpack.i.h.bf16 %v1233_v46  ;;  %v963_v57 = vunpack.i.l.bf16 %v1233_v46 }
  0x93   : > { %v553_v0 = vsel %vm548_vm2, %v543_v59, %v908_v52  ;;  %v554_v1 = vsel %vm548_vm2, %v544_v60, %v909_v51 }
  0x94   : > { %v274_v5 = vpop.permute.xlu2 %273  ;;  %v563_v8 = vsel %vm558_vm3, %v553_v0, %v913_v63  ;;  %v564_v9 = vsel %vm558_vm3, %v554_v1, %v914_v62 }
  0x95   : > { %v927_v6 = vpop.permute.xlu1 %926  ;;  %v1249_v7 = vsel %vm528_vm0, %v180_v61, %v274_v5  ;;  %v573_v17 = vsel %vm568_vm4, %v563_v8, %v918_v3  ;;  %v574_v18 = vsel %vm568_vm4, %v564_v9, %v919_v2 }
  0x96   : > { %v929_v10 = vunpack.i.h.bf16 %v927_v6  ;;  %v928_v11 = vunpack.i.l.bf16 %v927_v6  ;;  %v922_v12 = vpop.permute.xlu0 %921 }
  0x97   : > { %v924_v15 = vunpack.i.h.bf16 %v922_v12  ;;  %v923_v16 = vunpack.i.l.bf16 %v922_v12 }
  0x99   : > { %v583_v19 = vsel %vm578_vm5, %v573_v17, %v923_v16  ;;  %v584_v20 = vsel %vm578_vm5, %v574_v18, %v924_v15 }
  0x9a   : > { %v593_v21 = vsel %vm588_vm6, %v583_v19, %v928_v11  ;;  %v594_v22 = vsel %vm588_vm6, %v584_v20, %v929_v10 }
  0x9b   : > { %v603_v23 = vsel %vm598_vm7, %v593_v21, %v933_v14  ;;  %v604_v24 = vsel %vm598_vm7, %v594_v22, %v934_v13 }
  0x9c   : > { %v987_v4 = vpop.permute.xlu2 %986  ;;  %v613_v25 = vsel %vm608_vm8, %v603_v23, 0.0  ;;  %v614_v26 = vsel %vm608_vm8, %v604_v24, 0.0 }
  0x9d   : > { %v942_v27 = vpop.permute.xlu1 %941  ;;  %v620_v28 = vpack.c.bf16 %v614_v26, %v613_v25  ;;  %v989_v61 = vunpack.i.h.bf16 %v987_v4  ;;  %v988_v62 = vunpack.i.l.bf16 %v987_v4  ;;  %v174_v26 = vld [vmem:[%s1101_s17 + $0x10] sm:$0xff] }
  0x9e   : > { %v937_v29 = vpop.permute.xlu0 %936  ;;  %v944_v34 = vunpack.i.h.bf16 %v942_v27  ;;  %v943_v35 = vunpack.i.l.bf16 %v942_v27  ;;  %v175_v27 = vld [vmem:[%s1101_s17 + $0x18] sm:$0xff] }
  0x9f   : > { %v939_v30 = vunpack.i.h.bf16 %v937_v29  ;;  %v938_v31 = vunpack.i.l.bf16 %v937_v29  ;;  %836 = vmatmul.msk.bf16.vlgmr.msra.gmra.mxu2 %vm643_vm9, %v620_v28 }
  0xa1   : > { %v535_v36 = vsel %vm528_vm0, %v178_v32, %v938_v31  ;;  %v536_v38 = vsel %vm528_vm0, %v179_v33, %v939_v30 }
  0xa2   : > { %v545_v42 = vsel %vm538_vm1, %v535_v36, %v943_v35  ;;  %v546_v43 = vsel %vm538_vm1, %v536_v38, %v944_v34 }
  0xa3   : > { %v555_v53 = vsel %vm548_vm2, %v545_v42, %v948_v40  ;;  %v556_v54 = vsel %vm548_vm2, %v546_v43, %v949_v39 }
  0xa4   : > { %v1272_v41 = vpop.permute.xlu2 %996 }
  0xa5   : > { %v957_v47 = vpop.permute.xlu1 %956  ;;  %v998_v32 = vunpack.i.l.bf16 %v1272_v41 }
  0xa6   : > { %v952_v48 = vpop.permute.xlu0 %951  ;;  %v959_v51 = vunpack.i.h.bf16 %v957_v47  ;;  %v958_v52 = vunpack.i.l.bf16 %v957_v47 }
  0xa7   : > { %v954_v49 = vunpack.i.h.bf16 %v952_v48  ;;  %v953_v50 = vunpack.i.l.bf16 %v952_v48 }
  0xa9   : > { %v565_v55 = vsel %vm558_vm3, %v555_v53, %v953_v50  ;;  %v566_v37 = vsel %vm558_vm3, %v556_v54, %v954_v49 }
  0xaa   : > { %v575_v58 = vsel %vm568_vm4, %v565_v55, %v958_v52  ;;  %v576_v59 = vsel %vm568_vm4, %v566_v37, %v959_v51 }
  0xab   : > { %v585_v3 = vsel %vm578_vm5, %v575_v58, %v963_v57  ;;  %v586_v5 = vsel %vm578_vm5, %v576_v59, %v964_v56 }
  0xac   : > { %v1007_v60 = vpop.permute.xlu2 %1006 }
  0xad   : > { %v972_v63 = vpop.permute.xlu1 %971  ;;  %v1009_v39 = vunpack.i.h.bf16 %v1007_v60  ;;  %v1008_v40 = vunpack.i.l.bf16 %v1007_v60 }
  0xae   : > { %v974_v0 = vunpack.i.h.bf16 %v972_v63  ;;  %v973_v1 = vunpack.i.l.bf16 %v972_v63  ;;  %v967_v2 = vpop.permute.xlu0 %966 }
  0xaf   : > { %v969_v22 = vunpack.i.h.bf16 %v967_v2  ;;  %v968_v23 = vunpack.i.l.bf16 %v967_v2 }
  0xb0   : > { %v595_v6 = vsel %vm588_vm6, %v585_v3, %v973_v1  ;;  %v596_v8 = vsel %vm588_vm6, %v586_v5, %v974_v0 }
  0xb1   : > { %v605_v46 = vsel %vm598_vm7, %v595_v6, %v988_v62  ;;  %v606_v9 = vsel %vm598_vm7, %v596_v8, %v989_v61  ;;  %v531_v33 = vsel %vm528_vm0, %v174_v26, %v968_v23  ;;  %v532_v34 = vsel %vm528_vm0, %v175_v27, %v969_v22 }
  0xb2   : > { %v615_v10 = vsel %vm608_vm8, %v605_v46, 0.0  ;;  %v616_v11 = vsel %vm608_vm8, %v606_v9, 0.0 }
  0xb3   : > { %v621_v12 = vpack.c.bf16 %v616_v11, %v615_v10 }
  0xb4   : > { %v1017_v13 = vpop.permute.xlu2 %1016 }
  0xb5   : > { %v982_v14 = vpop.permute.xlu1 %981  ;;  %837 = vmatmul.msk.bf16.gmra.mxu2 %vm643_vm9, %v621_v12  ;;  %v1019_v50 = vunpack.i.h.bf16 %v1017_v13  ;;  %v1018_v51 = vunpack.i.l.bf16 %v1017_v13 }
  0xb6   : > { %v977_v15 = vpop.permute.xlu0 %976  ;;  %v984_v28 = vunpack.i.h.bf16 %v982_v14  ;;  %v983_v29 = vunpack.i.l.bf16 %v982_v14 }
  0xb7   : > { %v979_v16 = vunpack.i.h.bf16 %v977_v15  ;;  %v978_v17 = vunpack.i.l.bf16 %v977_v15 }
  0xb8   : > { %v541_v35 = vsel %vm538_vm1, %v531_v33, %v983_v29  ;;  %v542_v36 = vsel %vm538_vm1, %v532_v34, %v984_v28 }
  0xb9   : > { %v539_v18 = vsel %vm538_vm1, %v1228_v44, %v978_v17  ;;  %v540_v19 = vsel %vm538_vm1, %v1231_v45, %v979_v16  ;;  %v999_v45 = vunpack.i.h.bf16 %v1272_v41  ;;  %v551_v42 = vsel %vm548_vm2, %v541_v35, %v998_v32 }
  0xba   : > { %v561_v54 = vsel %vm558_vm3, %v551_v42, %v1008_v40 }
  0xbb   : > { %v552_v43 = vsel %vm548_vm2, %v542_v36, %v999_v45  ;;  %v571_v59 = vsel %vm568_vm4, %v561_v54, %v1018_v51 }
  0xbc   : > { %v1027_v20 = vpop.permute.xlu2 %1026  ;;  %v562_v55 = vsel %vm558_vm3, %v552_v43, %v1009_v39 }
  0xbd   : > { %v992_v21 = vpop.permute.xlu1 %991  ;;  %v1029_v37 = vunpack.i.h.bf16 %v1027_v20  ;;  %v1028_v56 = vunpack.i.l.bf16 %v1027_v20  ;;  %v572_v60 = vsel %vm568_vm4, %v562_v55, %v1019_v50 }
  0xbe   : > { %v994_v24 = vunpack.i.h.bf16 %v992_v21  ;;  %v993_v4 = vunpack.i.l.bf16 %v992_v21  ;;  %v310_v25 = vpop.permute.xlu0 %309 }
  0xbf   : > { %v547_v30 = vsel %vm538_vm1, %v1249_v7, %v310_v25  ;;  %v581_v62 = vsel %vm578_vm5, %v571_v59, %v1028_v56  ;;  %v582_v63 = vsel %vm578_vm5, %v572_v60, %v1029_v37 }
  0xc0   : > { %v549_v31 = vsel %vm548_vm2, %v539_v18, %v993_v4  ;;  %v550_v44 = vsel %vm548_vm2, %v540_v19, %v994_v24 }
  0xc4   : > { %v1037_v38 = vpop.permute.xlu2 %1036 }
  0xc5   : > { %v1002_v7 = vpop.permute.xlu1 %1001  ;;  %v1039_v57 = vunpack.i.h.bf16 %v1037_v38  ;;  %v1038_v58 = vunpack.i.l.bf16 %v1037_v38 }
  0xc6   : > { %v1004_v47 = vunpack.i.h.bf16 %v1002_v7  ;;  %v1003_v48 = vunpack.i.l.bf16 %v1002_v7  ;;  %v346_v49 = vpop.permute.xlu0 %345 }
  0xc7   : > { %v557_v41 = vsel %vm548_vm2, %v547_v30, %v346_v49  ;;  %v591_v3 = vsel %vm588_vm6, %v581_v62, %v1038_v58  ;;  %v592_v5 = vsel %vm588_vm6, %v582_v63, %v1039_v57 }
  0xc8   : > { %v559_v52 = vsel %vm558_vm3, %v549_v31, %v1003_v48  ;;  %v560_v53 = vsel %vm558_vm3, %v550_v44, %v1004_v47  ;;  %v1050_v47 = vld [vmem:[%s1364_s2] ss:$0 sm:$0xff] }
  0xcc   : > { %v1047_v61 = vpop.permute.xlu2 %1046 }
  0xcd   : > { %v1012_v0 = vpop.permute.xlu1 %1011  ;;  %v1049_v1 = vunpack.i.h.bf16 %v1047_v61  ;;  %v1048_v2 = vunpack.i.l.bf16 %v1047_v61 }
  0xce   : > { %v382_v6 = vpop.permute.xlu0 %381  ;;  %v1014_v17 = vunpack.i.h.bf16 %v1012_v0  ;;  %v1013_v18 = vunpack.i.l.bf16 %v1012_v0 }
  0xcf   : > { %v601_v8 = vsel %vm598_vm7, %v591_v3, %v1048_v2  ;;  %v602_v46 = vsel %vm598_vm7, %v592_v5, %v1049_v1  ;;  %v567_v9 = vsel %vm558_vm3, %v557_v41, %v382_v6 }
  0xd0   : > { %v611_v10 = vsel %vm608_vm8, %v601_v8, 0.0  ;;  %v612_v11 = vsel %vm608_vm8, %v602_v46, 0.0  ;;  %v569_v23 = vsel %vm568_vm4, %v559_v52, %v1013_v18  ;;  %v570_v24 = vsel %vm568_vm4, %v560_v53, %v1014_v17 }
  0xd1   : > { %v619_v12 = vpack.c.bf16 %v612_v11, %v611_v10 }
  0xd3   : > { %835 = vmatmul.msk.bf16.vlgmr.msra.gmra.mxu1 %vm643_vm9, %v619_v12 }
  0xd5   : > { %v1022_v13 = vpop.permute.xlu1 %1021 }
  0xd6   : > { %v418_v14 = vpop.permute.xlu0 %417  ;;  %v1024_v19 = vunpack.i.h.bf16 %v1022_v13  ;;  %v1023_v20 = vunpack.i.l.bf16 %v1022_v13 }
  0xd7   : > { %v577_v35 = vsel %vm568_vm4, %v567_v9, %v418_v14 }
  0xd8   : > { %v579_v25 = vsel %vm578_vm5, %v569_v23, %v1023_v20  ;;  %v580_v26 = vsel %vm578_vm5, %v570_v24, %v1024_v19 }
  0xdd   : > { %v1032_v15 = vpop.permute.xlu1 %1031 }
  0xde   : > { %v446_v16 = vpop.permute.xlu0 %445  ;;  %v1034_v21 = vunpack.i.h.bf16 %v1032_v15  ;;  %v1033_v22 = vunpack.i.l.bf16 %v1032_v15 }
  0xdf   : > { %v587_v36 = vsel %vm578_vm5, %v577_v35, %v446_v16 }
  0xe0   : > { %v589_v30 = vsel %vm588_vm6, %v579_v25, %v1033_v22  ;;  %v590_v31 = vsel %vm588_vm6, %v580_v26, %v1034_v21 }
  0xe5   : > { %v1042_v4 = vpop.permute.xlu1 %1041 }
  0xe6   : > { %v1044_v27 = vunpack.i.h.bf16 %v1042_v4  ;;  %v1043_v28 = vunpack.i.l.bf16 %v1042_v4  ;;  %v482_v29 = vpop.permute.xlu0 %481 }
  0xe7   : > { %v597_v38 = vsel %vm588_vm6, %v587_v36, %v482_v29 }
  0xe8   : > { %v599_v44 = vsel %vm598_vm7, %v589_v30, %v1043_v28  ;;  %v600_v45 = vsel %vm598_vm7, %v590_v31, %v1044_v27 }
  0xe9   : > { %v609_v32 = vsel %vm608_vm8, %v599_v44, 0.0  ;;  %v610_v33 = vsel %vm608_vm8, %v600_v45, 0.0 }
  0xea   : > { %v618_v34 = vpack.c.bf16 %v610_v33, %v609_v32 }
  0xec   : > { %834 = vmatmul.msk.bf16.vlgmr.msra.gmra.mxu0 %vm643_vm9, %v618_v34 }
  0xee   : > { %v518_v39 = vpop.permute.xlu0 %517 }
  0xef   : > { %v607_v40 = vsel %vm598_vm7, %v597_v38, %v518_v39 }
  0xf0   : > { %v617_v7 = vsel %vm608_vm8, %v607_v40, 0.0 }
  0xf1   : > { %v622_v42 = vpack.c.bf16 %v617_v7, %v617_v7 }
  0xf3   : > { %838 = vmatmul.msk.bf16.vlgmr.msra.gmra.mxu3 %vm643_vm9, %v622_v42 }
 0x122   : > { %v678_v43 = vpop.f32.mrf.mxu2 }
 0x123   : > { %v679_v48 = vadd.f32 %v1050_v47, %v678_v43 }
 0x125   : > { %v696_v50 = vmax.f32 %v679_v48, 0.0 }
 0x12a   : > { %v680_v49 = vpop.f32.mrf.mxu2 }
 0x12b   : > { %v681_v41 = vadd.f32 %v1050_v47, %v680_v49 }
 0x12d   : > { %v697_v51 = vmax.f32 %v681_v41, 0.0 }
 0x12f   : > { %v856_v52 = vpack.c.bf16 %v697_v51, %v696_v50 }
 0x131   : > { %864 = vst [vmem:[%s1352_s8 + $0x10] sm:$0xff] %v856_v52  }
 0x138   : > { %v683_v53 = vpop.f32.mrf.mxu2 }
 0x139   : > { %v684_v54 = vadd.f32 %v1050_v47, %v683_v53 }
 0x13b   : > { %v698_v56 = vmax.f32 %v684_v54, 0.0 }
 0x140   : > { %v685_v55 = vpop.f32.mrf.mxu2 }
 0x141   : > { %v686_v37 = vadd.f32 %v1050_v47, %v685_v55 }
 0x143   : > { %v699_v57 = vmax.f32 %v686_v37, 0.0 }
 0x145   : > { %v861_v58 = vpack.c.bf16 %v699_v57, %v698_v56 }
 0x147   : > { %865 = vst [vmem:[%s1352_s8 + $0x18] sm:$0xff] %v861_v58  }
 0x150   : > { %v673_v59 = vpop.f32.mrf.mxu1 }
 0x151   : > { %v674_v60 = vadd.f32 %v1050_v47, %v673_v59 }
 0x153   : > { %v694_v63 = vmax.f32 %v674_v60, 0.0 }
 0x158   : > { %v675_v61 = vpop.f32.mrf.mxu1 }
 0x159   : > { %v676_v62 = vadd.f32 %v1050_v47, %v675_v61 }
 0x15b   : > { %v695_v0 = vmax.f32 %v676_v62, 0.0 }
 0x15d   : > { %v851_v1 = vpack.c.bf16 %v695_v0, %v694_v63 }
 0x15f   : > { %863 = vst [vmem:[%s1352_s8 + $0x8] sm:$0xff] %v851_v1  }
 0x169   : > { %v668_v2 = vpop.f32.mrf.mxu0 }
 0x16a   : > { %v669_v3 = vadd.f32 %v1050_v47, %v668_v2 }
 0x16c   : > { %v692_v8 = vmax.f32 %v669_v3, 0.0 }
 0x171   : > { %v670_v5 = vpop.f32.mrf.mxu0 }
 0x172   : > { %v671_v6 = vadd.f32 %v1050_v47, %v670_v5 }
 0x174   : > { %v693_v46 = vmax.f32 %v671_v6, 0.0 }
 0x176   : > { %v846_v9 = vpack.c.bf16 %v693_v46, %v692_v8  ;;  %v688_v10 = vpop.f32.mrf.mxu3 }
 0x177   : > { %v689_v11 = vadd.f32 %v1050_v47, %v688_v10 }
 0x178   : > { %847 = vst [vmem:[%s1352_s8] sm:$0xff] %v846_v9  }
 0x179   : > { %v700_v12 = vmax.f32 %v689_v11, 0.0 }
 0x17b   : > { %v709_v13 = vpack.c.bf16 %v700_v12, %v700_v12 }
 0x17d   : > { %718 = vst [vmem:[%s1352_s8 + $0x20] sm:$0xf] %v709_v13 }
 0x17e   : > { %v690_v14 = vpop.f32.mrf.mxu3 }
 0x17f PF: > { %s13_s12 = sadd.s32 1, %s1057_s12  }
 0x180   : > { %p10_p4 = scmp.ge.s32.totalorder %s13_s12, 12  }
 0x182   :  { %12 = sbr.rel (!%p10_p4) target bundleno = 1 (0x1), region = 65 }

// kernel: fewshot_seg_forward.4
= control target key start
LH: loop header
LB: loop body
LE: loop exit
PB: predicated region body
PF: predicated region fallthrough
CT: control target
= control target key end

     0   :  { %s658_s9 = smov 0   ;;  %s660_s10 = smov 0   ;;  %s744_s0 = inlined_call_operand.vmem [shape: bf16[8,72,128], index: 0, kind: input, shape index: {}]   ;;  %s745_s1 = inlined_call_operand.vmem [shape: f32[8,2,72], index: 1, kind: input, shape index: {}]   ;;  %s746_s2 = inlined_call_operand.vmem [shape: f32[8,2,128], index: 2, kind: output, shape index: {}]  }
   0x1   :  { %s662_s11 = smov 0  }
   0x2 LB: > { %s24_s12 = sadd.s32 1, %s636_s10  ;;  %p490_p0 = scmp.ge.s32.totalorder %s640_s11, 1  ;;  %s640_s11 = sphi %s662_s11, %s12_s11   ;;  %s636_s10 = sphi %s660_s10, %s748_s10   ;;  %s632_s9 = sphi %s658_s9, %s747_s9  }
   0x3   : > { %p26_p1 = scmp.ge.s32.totalorder %s24_s12, 2  ;;  %p149_p2 = scmp.lt.s32.totalorder %s640_s11, 3 }
   0x5   : > { %s750_s12 = smov (%p26_p1, %s24_s12), 0  ;;  %p150_p3 = pnand %p490_p0, %p149_p2 }
   0x6   : > { %s491_s13 = sshll.u32 (!%p150_p3), %s632_s9, 2 }
   0x7   : > { %153 = sbr.rel (%p150_p3) target bundleno = 172 (0xac), region = 28  ;;  %p186_p4 = scmp.lt.s32.totalorder (!%p150_p3), %s491_s13, 7 }
   0xc   : > { %s752_s13 = smov (!%p186_p4, %s491_s13), 7  ;;  %v642_v3 = vmov 0.0   ;;  %vm299_vm0 = vcmask 588800  }
   0xd   : > { %s592_s14 = smul.u32 36, %s752_s13  ;;  %s494_s15 = sshll.u32 %s752_s13, 1 }
   0xe   : > { %s685_s18 = scalar_lea.vmem %s746_s2, %s494_s15  ;;  %s203_s24 = scalar_lea.vmem %s745_s1, %s494_s15 }
   0xf   : > { %s690_s21 = scalar_lea.vmem %s744_s0, %s592_s14  ;;  %215 = vst [vmem:[%s685_s18] sm:$0x3] %v642_v3  ;;  %v297_v53 = vld [vmem:[%s203_s24 + $0x4] sm:$0x3]  ;;  %v298_v54 = vld [vmem:[%s203_s24 + $0x6] sm:$0x3] }
  0x10   : > { %v693_v0 = vld [vmem:[%s690_s21 + $0x68] sm:$0xff]   ;;  %v586_v2 = vld [vmem:[%s690_s21 + $0x60] sm:$0xff]   ;;  %216 = vst [vmem:[%s685_s18 + $0x2] sm:$0x3] %v642_v3  ;;  %v577_v13 = vld [vmem:[%s690_s21 + $0x18] sm:$0xff]  }
  0x11   : > { %v591_v1 = vld [vmem:[%s690_s21 + $0x88] sm:$0xff]   ;;  %v557_v4 = vunpack.c.l.bf16 %v693_v0  ;;  %v554_v6 = vunpack.c.h.bf16 %v586_v2  ;;  %v700_v8 = vld [vmem:[%s690_s21 + $0x20] sm:$0xff]   ;;  %v585_v14 = vld [vmem:[%s690_s21 + $0x58] sm:$0xff]   ;;  %217 = vst [vmem:[%s685_s18 + $0x4] sm:$0x3] %v642_v3  ;;  %v553_v16 = vunpack.c.l.bf16 %v586_v2  ;;  %v518_v18 = vunpack.c.h.bf16 %v577_v13 }
  0x12   : > { %v574_v5 = vunpack.c.h.bf16 %v591_v1  ;;  %v573_v7 = vunpack.c.l.bf16 %v591_v1  ;;  %v582_v9 = vld [vmem:[%s690_s21 + $0x40] sm:$0xff]   ;;  %v521_v11 = vunpack.c.l.bf16 %v700_v8  ;;  %v581_v15 = vld [vmem:[%s690_s21 + $0x38] sm:$0xff]   ;;  %v576_v20 = vld [vmem:[%s690_s21 + $0x10] sm:$0xff]   ;;  %218 = vst [vmem:[%s685_s18 + $0x6] sm:$0x3] %v642_v3  ;;  %v517_v21 = vunpack.c.l.bf16 %v577_v13 }
  0x13   : > { %v590_v10 = vld [vmem:[%s690_s21 + $0x80] sm:$0xff]   ;;  %v538_v12 = vunpack.c.h.bf16 %v582_v9  ;;  %356 = vmatpush.msra.mxu2 %v557_v4  ;;  %v537_v19 = vunpack.c.l.bf16 %v582_v9  ;;  %v534_v22 = vunpack.c.h.bf16 %v581_v15  ;;  %v589_v23 = vld [vmem:[%s690_s21 + $0x78] sm:$0xff]   ;;  %v550_v24 = vunpack.c.h.bf16 %v585_v14  ;;  %v580_v26 = vld [vmem:[%s690_s21 + $0x30] sm:$0xff]  }
  0x14   : > { %379 = vmatpush.msra.mxu3 %v574_v5  ;;  %v570_v17 = vunpack.c.h.bf16 %v590_v10  ;;  %310 = vmatpush.msra.mxu0 %v521_v11  ;;  %v569_v25 = vunpack.c.l.bf16 %v590_v10  ;;  %v514_v27 = vunpack.c.h.bf16 %v576_v20  ;;  %v584_v28 = vld [vmem:[%s690_s21 + $0x50] sm:$0xff]   ;;  %v533_v29 = vunpack.c.l.bf16 %v581_v15  ;;  %v575_v32 = vld [vmem:[%s690_s21 + $0x8] sm:$0xff]   ;;  %v504_v44 = vld [vmem:[%s690_s21] sm:$0xff]  }
  0x15   : > { %333 = vmatpush.msra.mxu1 %v538_v12  ;;  %357 = vmatpush.msra.mxu2 %v554_v6  ;;  %v549_v30 = vunpack.c.l.bf16 %v585_v14  ;;  %v566_v31 = vunpack.c.h.bf16 %v589_v23  ;;  %v513_v33 = vunpack.c.l.bf16 %v576_v20  ;;  %v530_v34 = vunpack.c.h.bf16 %v580_v26  ;;  %v588_v35 = vld [vmem:[%s690_s21 + $0x70] sm:$0xff]   ;;  %v579_v38 = vld [vmem:[%s690_s21 + $0x28] sm:$0xff]   ;;  %v295_v57 = vld [vmem:[%s203_s24] sm:$0x3] }
  0x16   : > { %380 = vmatpush.msra.mxu3 %v573_v7  ;;  %311 = vmatpush.msra.mxu0 %v518_v18  ;;  %v546_v36 = vunpack.c.h.bf16 %v584_v28  ;;  %v565_v37 = vunpack.c.l.bf16 %v589_v23  ;;  %v510_v39 = vunpack.c.h.bf16 %v575_v32  ;;  %v583_v40 = vld [vmem:[%s690_s21 + $0x48] sm:$0xff]   ;;  %v529_v41 = vunpack.c.l.bf16 %v580_v26  ;;  %v296_v58 = vld [vmem:[%s203_s24 + $0x2] sm:$0x3]  ;;  %v291_v59 = vld [vmem:[%s685_s18] sm:$0x3] }
  0x17   : > { %334 = vmatpush.msra.mxu1 %v537_v19  ;;  %358 = vmatpush.msra.mxu2 %v553_v16  ;;  %v545_v42 = vunpack.c.l.bf16 %v584_v28  ;;  %v562_v43 = vunpack.c.h.bf16 %v588_v35  ;;  %v509_v45 = vunpack.c.l.bf16 %v575_v32  ;;  %v526_v46 = vunpack.c.h.bf16 %v579_v38  ;;  %v292_v60 = vld [vmem:[%s685_s18 + $0x2] sm:$0x3] }
  0x18   : > { %381 = vmatpush.msra.mxu3 %v570_v17  ;;  %312 = vmatpush.msra.mxu0 %v517_v21  ;;  %v542_v47 = vunpack.c.h.bf16 %v583_v40  ;;  %v561_v48 = vunpack.c.l.bf16 %v588_v35  ;;  %v506_v49 = vunpack.c.h.bf16 %v504_v44  ;;  %v525_v50 = vunpack.c.l.bf16 %v579_v38  ;;  %v293_v63 = vld [vmem:[%s685_s18 + $0x4] sm:$0x3] }
  0x19   : > { %335 = vmatpush.msra.mxu1 %v534_v22  ;;  %359 = vmatpush.msra.mxu2 %v550_v24  ;;  %v541_v51 = vunpack.c.l.bf16 %v583_v40  ;;  %v558_v52 = vunpack.c.h.bf16 %v693_v0  ;;  %v505_v55 = vunpack.c.l.bf16 %v504_v44  ;;  %v522_v56 = vunpack.c.h.bf16 %v700_v8  ;;  %v294_v0 = vld [vmem:[%s685_s18 + $0x6] sm:$0x3] }
  0x1a   : > { %382 = vmatpush.msra.mxu3 %v569_v25  ;;  %313 = vmatpush.msra.mxu0 %v514_v27 }
  0x1b   : > { %336 = vmatpush.msra.mxu1 %v533_v29  ;;  %360 = vmatpush.msra.mxu2 %v549_v30 }
  0x1c   : > { %383 = vmatpush.msra.mxu3 %v566_v31  ;;  %314 = vmatpush.msra.mxu0 %v513_v33 }
  0x1d   : > { %337 = vmatpush.msra.mxu1 %v530_v34  ;;  %361 = vmatpush.msra.mxu2 %v546_v36 }
  0x1e   : > { %384 = vmatpush.msra.mxu3 %v565_v37  ;;  %315 = vmatpush.msra.mxu0 %v510_v39 }
  0x1f   : > { %338 = vmatpush.msra.mxu1 %v529_v41  ;;  %362 = vmatpush.msra.mxu2 %v545_v42 }
  0x20   : > { %385 = vmatpush.msra.mxu3 %v562_v43  ;;  %316 = vmatpush.msra.mxu0 %v509_v45 }
  0x21   : > { %339 = vmatpush.msra.mxu1 %v526_v46  ;;  %363 = vmatpush.msra.mxu2 %v542_v47 }
  0x22   : > { %386 = vmatpush.msra.mxu3 %v561_v48  ;;  %317 = vmatpush.msra.mxu0 %v506_v49 }
  0x23   : > { %340 = vmatpush.msra.mxu1 %v525_v50  ;;  %364 = vmatpush.msra.mxu2 %v541_v51 }
  0x24   : > { %387 = vmatpush.msra.mxu3 %v558_v52  ;;  %499 = vmatmul.msk.f32.vlgmr.msra.gmra.mxu2 %vm299_vm0, %v297_v53 }
  0x25   : > { %500 = vmatmul.msk.f32.vlgmr.msra.gmra.mxu3 %vm299_vm0, %v298_v54  ;;  %318 = vmatpush.msra.mxu0 %v505_v55 }
  0x26   : > { %341 = vmatpush.msra.mxu1 %v522_v56  ;;  %497 = vmatmul.msk.f32.vlgmr.msra.gmra.mxu0 %vm299_vm0, %v295_v57 }
  0x27   : > { %498 = vmatmul.msk.f32.vlgmr.msra.gmra.mxu1 %vm299_vm0, %v296_v58 }
  0xa3   : > { %v320_v61 = vpop.f32.mrf.mxu0 }
  0xa4   : > { %v343_v62 = vpop.f32.mrf.mxu1  ;;  %v392_v1 = vadd.f32 %v320_v61, %v291_v59 }
  0xa5   : > { %v393_v2 = vadd.f32 %v343_v62, %v292_v60 }
  0xa6   : > { %396 = vst [vmem:[%s685_s18] sm:$0x3] %v392_v1 }
  0xa7   : > { %v366_v3 = vpop.f32.mrf.mxu2  ;;  %397 = vst [vmem:[%s685_s18 + $0x2] sm:$0x3] %v393_v2 }
  0xa8   : > { %v389_v4 = vpop.f32.mrf.mxu3  ;;  %v394_v5 = vadd.f32 %v366_v3, %v293_v63 }
  0xa9   : > { %v395_v6 = vadd.f32 %v389_v4, %v294_v0 }
  0xaa   : > { %398 = vst [vmem:[%s685_s18 + $0x4] sm:$0x3] %v394_v5 }
  0xab   : > { %399 = vst [vmem:[%s685_s18 + $0x6] sm:$0x3] %v395_v6 }
  0xac PF: > { %s12_s11 = sadd.s32 1, %s640_s11   ;;  %s747_s9 = smov %s636_s10 }
  0xad   : > { %p9_p5 = scmp.ge.s32.totalorder %s12_s11, 4   ;;  %s748_s10 = smov %s750_s12 }
  0xaf   :  { %11 = sbr.rel (!%p9_p5) target bundleno = 2 (0x2), region = 65 }

// kernel: fewshot_seg_forward.5
= control target key start
LH: loop header
LB: loop body
LE: loop exit
PB: predicated region body
PF: predicated region fallthrough
CT: control target
= control target key end

     0   :  { %s671_s9 = smov 0   ;;  %s673_s10 = smov 0   ;;  %s890_s0 = inlined_call_operand.vmem [shape: f32[2,3,128], index: 0, kind: input, shape index: {}]   ;;  %s891_s1 = inlined_call_operand.vmem [shape: bf16[2,72,128], index: 1, kind: input, shape index: {}]   ;;  %s892_s2 = inlined_call_operand.vmem [shape: f32[2,3,72], index: 2, kind: output, shape index: {}]  }
   0x1   :  { %s675_s11 = smov 0  }
   0x2 LB: > { %s24_s12 = sadd.s32 1, %s649_s10  ;;  %p557_p0 = scmp.ge.s32.totalorder %s653_s11, 1  ;;  %s653_s11 = sphi %s675_s11, %s12_s11   ;;  %s649_s10 = sphi %s673_s10, %s908_s10   ;;  %s645_s9 = sphi %s671_s9, %s907_s9  }
   0x3   : > { %p26_p1 = scmp.ge.s32.totalorder %s24_s12, 2  ;;  %p142_p2 = scmp.lt.s32.totalorder %s653_s11, 3 }
   0x5   : > { %s910_s12 = smov (%p26_p1, %s24_s12), 0  ;;  %p143_p3 = pnand %p557_p0, %p142_p2 }
   0x6   : > { %p174_p4 = scmp.lt.s32.totalorder (!%p143_p3), %s645_s9, 1 }
   0x7   : > { %146 = sbr.rel (%p143_p3) target bundleno = 285 (0x11d), region = 28 }
   0xc   : > { %s912_s9 = smov (!%p174_p4, %s645_s9), 1  ;;  %vm202_vm0 = vcmask 1042432   ;;  %v655_v35 = vmov 0   ;;  %vm218_vm4 = vcmask 2048  }
   0xd   : > { %s558_s13 = sshll.u32 %s912_s9, 2  ;;  %s583_s14 = smul.u32 36, %s912_s9  ;;  %609 = vset.pattern.permute.xlu1 %v655_v35  ;;  %610 = vset.pattern.permute.xlu0 %v655_v35 }
   0xe   : > { %s698_s17 = scalar_lea.vmem %s890_s0, %s558_s13  ;;  %s194_s23 = scalar_lea.vmem %s892_s2, %s558_s13 }
   0xf   : > { %s703_s20 = scalar_lea.vmem %s891_s1, %s583_s14  ;;  %v200_v0 = vld [vmem:[%s698_s17] sm:$0x7] }
  0x10   : > { %v201_v1 = vmul.f32 %v200_v0, %v200_v0  ;;  %v221_v2 = vld [vmem:[%s703_s20 + $0x4] sm:$0xff]   ;;  %v223_v3 = vld [vmem:[%s703_s20 + $0xc] sm:$0xff]   ;;  %v220_v4 = vld [vmem:[%s703_s20] sm:$0xf] }
  0x11   : > { %v273_v5 = vunpack.c.l.bf16 %v221_v2  ;;  %v275_v6 = vunpack.c.l.bf16 %v223_v3  ;;  %v228_v7 = vld [vmem:[%s703_s20 + $0x20] sm:$0xf]  ;;  %v272_v12 = vunpack.c.l.bf16 %v220_v4  ;;  %v274_v14 = vunpack.c.h.bf16 %v221_v2  ;;  %v225_v17 = vld [vmem:[%s703_s20 + $0x14] sm:$0xff]   ;;  %v227_v21 = vld [vmem:[%s703_s20 + $0x1c] sm:$0xf] }
  0x12   : > { %v203_v8 = vsel %vm202_vm0, %v201_v1, 0.0  ;;  %v248_v9 = vunpack.c.l.b16 %v228_v7  ;;  %v276_v15 = vunpack.c.h.bf16 %v223_v3  ;;  %v582_v20 = vld [vmem:[%s703_s20 + $0x18] sm:$0xff]  ;;  %v277_v22 = vunpack.c.l.bf16 %v225_v17  ;;  %v581_v28 = vld [vmem:[%s703_s20 + $0x10] sm:$0xff]  ;;  %v580_v31 = vld [vmem:[%s703_s20 + $0x8] sm:$0xff] }
  0x13   : > { %204 = vadd.xlane.f32.xlu0 %v203_v8  ;;  %v282_v10 = vmul.f32 %v273_v5, %v273_v5  ;;  %v284_v11 = vmul.f32 %v275_v6, %v275_v6  ;;  %v281_v16 = vmul.f32 %v272_v12, %v272_v12  ;;  %v283_v18 = vmul.f32 %v274_v14, %v274_v14  ;;  %v579_v32 = vld [vmem:[%s703_s20] sm:$0xff] }
  0x14   : > { %v253_v13 = vpack.c.b16 %v248_v9, %v248_v9  ;;  %v285_v19 = vmul.f32 %v276_v15, %v276_v15  ;;  %v278_v23 = vunpack.c.h.bf16 %v225_v17  ;;  %v279_v24 = vunpack.c.l.bf16 %v227_v21  ;;  %v229_v33 = vld [vmem:[%s698_s17] sm:$0x7] }
  0x15   : > { %292 = vadd.xlane.f32.xlu1 %v282_v10  ;;  %296 = vadd.xlane.f32.xlu2 %v284_v11  ;;  %v286_v25 = vmul.f32 %v277_v22, %v277_v22  ;;  %v280_v29 = vunpack.c.l.bf16 %v228_v7  ;;  %v230_v34 = vpack.c.bf16 %v229_v33, %v229_v33 }
  0x16   : > { %262 = vmatpush.bf16.xpose.msra.mxu0 %v253_v13  ;;  %v287_v26 = vmul.f32 %v278_v23, %v278_v23  ;;  %v288_v27 = vmul.f32 %v279_v24, %v279_v24 }
  0x17   : > { %v289_v30 = vmul.f32 %v280_v29, %v280_v29 }
  0x1b   : > { %290 = vadd.xlane.f32.xlu0 %v281_v16 }
  0x1d   : > { %294 = vadd.xlane.f32.xlu1 %v283_v18  ;;  %298 = vadd.xlane.f32.xlu2 %v285_v19  ;;  %v423_v19 = vlaneseq }
  0x1e   : > { %263 = vmatpush.bf16.xpose.msra.mxu0 %v582_v20 }
  0x23   : > { %300 = vadd.xlane.f32.xlu0 %v286_v25 }
  0x25   : > { %302 = vadd.xlane.f32.xlu1 %v287_v26  ;;  %304 = vadd.xlane.f32.xlu2 %v288_v27 }
  0x26   : > { %264 = vmatpush.bf16.xpose.msra.mxu0 %v581_v28  ;;  %v774_v28 = vand.u32 127, %v423_v19 }
  0x2b   : > { %306 = vadd.xlane.f32.xlu0 %v289_v30 }
  0x2e   : > { %265 = vmatpush.bf16.xpose.msra.mxu0 %v580_v31 }
  0x36   : > { %266 = vmatpush.bf16.xpose.msra.mxu0 %v579_v32 }
  0x3d   : > { %267 = vmatmul.bf16.vlgmr.msra.gmra.mxu0 %v230_v34 }
  0x86   : > { %v205_v36 = vpop.xlane.xlu0 %204 }
  0x87   : > { %v206_v37 = vmax.f32 %v205_v36, 1e-16 }
  0x88   : > { %v293_v47 = vpop.xlane.xlu1 %292  ;;  %v297_v48 = vpop.xlane.xlu2 %296 }
  0x89   : > { %611 = vrsqrt.f32 %v206_v37  ;;  %vm213_vm2 = vweird.f32 %v206_v37  ;;  %v309_v50 = vmax.f32 %v293_v47, 1e-16  ;;  %v722_v54 = vmax.f32 %v297_v48, 1e-16 }
  0x8b   : > { %613 = vrsqrt.f32 %v309_v50  ;;  %vm333_vm5 = vweird.f32 %v309_v50  ;;  %vm353_vm13 = vweird.f32 %v722_v54 }
  0x8e   : > { %v291_v49 = vpop.xlane.xlu0 %290 }
  0x8f   : > { %v612_v38 = vpop.eup %611  ;;  %v717_v51 = vmax.f32 %v291_v49, 1e-16 }
  0x90   : > { %v208_v39 = vmul.f32 %v612_v38, %v206_v37  ;;  %vm214_vm1 = vweird.f32 %v612_v38  ;;  %v295_v52 = vpop.xlane.xlu1 %294  ;;  %v299_v55 = vpop.xlane.xlu2 %298 }
  0x91   : > { %vm215_vm3 = vmor %vm213_vm2, %vm214_vm1  ;;  %v719_v53 = vmax.f32 %v295_v52, 1e-16  ;;  %615 = vrsqrt.f32 %v717_v51  ;;  %v725_v57 = vpop.eup %613  ;;  %v728_v58 = vmax.f32 %v299_v55, 1e-16  ;;  %vm323_vm7 = vweird.f32 %v717_v51 }
  0x92   : > { %v209_v40 = vmul.f32 %v612_v38, %v208_v39  ;;  %v328_v63 = vmul.f32 %v725_v57, %v309_v50  ;;  %vm334_vm6 = vweird.f32 %v725_v57  ;;  %v430_v52 = vadd.s32 4294967280, %v774_v28 }
  0x93   : > { %617 = vrsqrt.f32 %v719_v53  ;;  %vm783_vm9 = vmor %vm333_vm5, %vm334_vm6  ;;  %vm343_vm11 = vweird.f32 %v719_v53  ;;  %vm363_vm1 = vweird.f32 %v728_v58 }
  0x94   : > { %v210_v41 = vmul.f32 0.5, %v209_v40  ;;  %619 = vrsqrt.f32 %v722_v54  ;;  %v329_v6 = vmul.f32 %v725_v57, %v328_v63  ;;  %v426_v40 = vadd.s32 4294967288, %v774_v28 }
  0x95   : > { %621 = vrsqrt.f32 %v728_v58 }
  0x96   : > { %v211_v42 = vsub.f32 1.5, %v210_v41  ;;  %v301_v56 = vpop.xlane.xlu0 %300  ;;  %v330_v13 = vmul.f32 0.5, %v329_v6 }
  0x97   : > { %v730_v59 = vpop.eup %615  ;;  %v732_v60 = vmax.f32 %v301_v56, 1e-16 }
  0x98   : > { %v212_v43 = vmul.f32 %v612_v38, %v211_v42  ;;  %v303_v61 = vpop.xlane.xlu1 %302  ;;  %v318_v0 = vmul.f32 %v730_v59, %v717_v51  ;;  %v305_v3 = vpop.xlane.xlu2 %304  ;;  %v331_v23 = vsub.f32 1.5, %v330_v13  ;;  %vm324_vm8 = vweird.f32 %v730_v59 }
  0x99   : > { %v734_v62 = vpop.eup %617  ;;  %v742_v2 = vmax.f32 %v303_v61, 1e-16  ;;  %623 = vrsqrt.f32 %v732_v60  ;;  %v753_v9 = vmax.f32 %v305_v3, 1e-16  ;;  %vm789_vm10 = vmor %vm323_vm7, %vm324_vm8  ;;  %vm373_vm5 = vweird.f32 %v732_v60 }
  0x9a   : > { %v216_v44 = vsel %vm215_vm3, %v612_v38, %v212_v43  ;;  %v740_v1 = vpop.eup %619  ;;  %v338_v4 = vmul.f32 %v734_v62, %v719_v53  ;;  %v319_v7 = vmul.f32 %v730_v59, %v318_v0  ;;  %v332_v32 = vmul.f32 %v725_v57, %v331_v23 }
  0x9b   : > { %v217_v45 = vmul.f32 20.0, %v216_v44  ;;  %v348_v8 = vmul.f32 %v740_v1, %v722_v54  ;;  %v755_v11 = vpop.eup %621  ;;  %625 = vrsqrt.f32 %v742_v2  ;;  %vm344_vm12 = vweird.f32 %v734_v62 }
  0x9c   : > { %v339_v12 = vmul.f32 %v734_v62, %v338_v4  ;;  %v320_v14 = vmul.f32 0.5, %v319_v7  ;;  %v358_v18 = vmul.f32 %v755_v11, %v728_v58  ;;  %627 = vrsqrt.f32 %v753_v9  ;;  %vm810_vm15 = vmor %vm343_vm11, %vm344_vm12 }
  0x9d   : > { %219 = vst.msk [vmem:[#allocation2] sm:$0x7] %vm218_vm4, %v217_v45  ;;  %v349_v17 = vmul.f32 %v740_v1, %v348_v8  ;;  %vm354_vm14 = vweird.f32 %v740_v1  ;;  %v336_v44 = vsel %vm783_vm9, %v725_v57, %v332_v32  ;;  %vm364_vm2 = vweird.f32 %v755_v11 }
  0x9e   : > { %v307_v10 = vpop.xlane.xlu0 %306  ;;  %v340_v20 = vmul.f32 0.5, %v339_v12  ;;  %v321_v24 = vsub.f32 1.5, %v320_v14  ;;  %v359_v27 = vmul.f32 %v755_v11, %v358_v18  ;;  %vm817_vm0 = vmor %vm353_vm13, %vm354_vm14  ;;  %v427_v54 = vperm.slane %v336_v44, %v426_v40 }
  0x9f   : > { %v759_v15 = vmax.f32 %v307_v10, 1e-16  ;;  %v761_v16 = vpop.eup %623  ;;  %v350_v26 = vmul.f32 0.5, %v349_v17  ;;  %vm428_vm3 = vcmask 130112   ;;  %vm835_vm4 = vmor %vm363_vm1, %vm364_vm2  ;;  %vm432_vm7 = vcmask 195712  }
  0xa0   : > { %v368_v25 = vmul.f32 %v761_v16, %v732_v60  ;;  %v341_v30 = vsub.f32 1.5, %v340_v20  ;;  %v322_v34 = vmul.f32 %v730_v59, %v321_v24  ;;  %v360_v38 = vmul.f32 0.5, %v359_v27 }
  0xa1   : > { %v767_v22 = vpop.eup %625  ;;  %629 = vrsqrt.f32 %v759_v15  ;;  %v351_v36 = vsub.f32 1.5, %v350_v26  ;;  %vm374_vm6 = vweird.f32 %v761_v16  ;;  %vm383_vm9 = vweird.f32 %v742_v2 }
  0xa2   : > { %v778_v29 = vpop.eup %627  ;;  %v378_v31 = vmul.f32 %v767_v22, %v742_v2  ;;  %v369_v35 = vmul.f32 %v761_v16, %v368_v25  ;;  %v342_v42 = vmul.f32 %v734_v62, %v341_v30  ;;  %v326_v45 = vsel %vm789_vm10, %v730_v59, %v322_v34  ;;  %vm846_vm8 = vmor %vm373_vm5, %vm374_vm6 }
  0xa3   : > { %v388_v41 = vmul.f32 %v778_v29, %v753_v9  ;;  %v352_v48 = vmul.f32 %v740_v1, %v351_v36  ;;  %v361_v49 = vsub.f32 1.5, %v360_v38  ;;  %v425_v55 = vperm.slane %v326_v45, %v774_v28 }
  0xa4   : > { %v407_v46 = vld [vmem:[#allocation2] sm:$0x7]  ;;  %v379_v43 = vmul.f32 %v767_v22, %v378_v31  ;;  %v370_v47 = vmul.f32 0.5, %v369_v35  ;;  %v346_v56 = vsel %vm810_vm15, %v734_v62, %v342_v42  ;;  %v434_v59 = vadd.s32 4294967272, %v774_v28 }
  0xa5   : > { %410 = vperm.xlu1 %609, %v407_v46   ;;  %v389_v53 = vmul.f32 %v778_v29, %v388_v41  ;;  %v356_v58 = vsel %vm817_vm0, %v740_v1, %v352_v48  ;;  %v362_v63 = vmul.f32 %v755_v11, %v361_v49  ;;  %v431_v3 = vperm.slane %v346_v56, %v430_v52 }
  0xa6   : > { %v380_v57 = vmul.f32 0.5, %v379_v43  ;;  %v371_v61 = vsub.f32 1.5, %v370_v47  ;;  %v429_v6 = vsel %vm428_vm3, %v427_v54, %v425_v55  ;;  %v435_v8 = vperm.slane %v356_v58, %v434_v59 }
  0xa7   : > { %v795_v39 = vpop.eup %629  ;;  %v390_v62 = vmul.f32 0.5, %v389_v53  ;;  %v438_v1 = vadd.s32 4294967264, %v774_v28  ;;  %v366_v12 = vsel %vm835_vm4, %v755_v11, %v362_v63  ;;  %vm384_vm10 = vweird.f32 %v767_v22 }
  0xa8   : > { %v398_v50 = vmul.f32 %v795_v39, %v759_v15  ;;  %v381_v7 = vsub.f32 1.5, %v380_v57  ;;  %v372_v10 = vmul.f32 %v761_v16, %v371_v61  ;;  %v433_v14 = vsel %vm432_vm7, %v431_v3, %v429_v6  ;;  %vm857_vm12 = vmor %vm383_vm9, %vm384_vm10 }
  0xa9   : > { %v391_v17 = vsub.f32 1.5, %v390_v62  ;;  %vm436_vm11 = vcmask 261312   ;;  %v442_v18 = vadd.s32 4294967256, %v774_v28  ;;  %v439_v20 = vperm.slane %v366_v12, %v438_v1 }
  0xaa   : > { %v399_v0 = vmul.f32 %v795_v39, %v398_v50  ;;  %v382_v19 = vmul.f32 %v767_v22, %v381_v7  ;;  %v376_v11 = vsel %vm846_vm8, %v761_v16, %v372_v10  ;;  %vm393_vm13 = vweird.f32 %v753_v9 }
  0xab   : > { %vm394_vm14 = vweird.f32 %v778_v29  ;;  %vm440_vm15 = vcmask 326912   ;;  %v437_v23 = vsel %vm436_vm11, %v435_v8, %v433_v14  ;;  %v446_v24 = vadd.s32 4294967248, %v774_v28 }
  0xac   : > { %v400_v60 = vmul.f32 0.5, %v399_v0  ;;  %v392_v25 = vmul.f32 %v778_v29, %v391_v17  ;;  %v443_v26 = vperm.slane %v376_v11, %v442_v18  ;;  %v386_v16 = vsel %vm857_vm12, %v767_v22, %v382_v19  ;;  %vm395_vm0 = vmor %vm393_vm13, %vm394_vm14 }
  0xad   : > { %vm403_vm1 = vweird.f32 %v759_v15  ;;  %vm404_vm2 = vweird.f32 %v795_v39  ;;  %vm444_vm3 = vcmask 392512   ;;  %v441_v9 = vsel %vm440_vm15, %v439_v20, %v437_v23 }
  0xae   : > { %v401_v2 = vsub.f32 1.5, %v400_v60  ;;  %v450_v27 = vadd.s32 4294967240, %v774_v28  ;;  %v447_v31 = vperm.slane %v386_v16, %v446_v24  ;;  %v396_v32 = vsel %vm395_vm0, %v778_v29, %v392_v25  ;;  %vm405_vm4 = vmor %vm403_vm1, %vm404_vm2 }
  0xaf   : > { %vm448_vm5 = vcmask 458112   ;;  %v445_v33 = vsel %vm444_vm3, %v443_v26, %v441_v9  ;;  %v454_v22 = vadd.s32 4294967232, %v774_v28  ;;  %vm452_vm6 = vcmask 523712  }
  0xb0   : > { %v402_v30 = vmul.f32 %v795_v39, %v401_v2  ;;  %v451_v34 = vperm.slane %v396_v32, %v450_v27  ;;  %v449_v35 = vsel %vm448_vm5, %v447_v31, %v445_v33  ;;  %vm456_vm7 = vcmask 589312  }
  0xb1   : > { %vm462_vm8 = vcmask 583680  }
  0xb2   : > { %v406_v15 = vsel %vm405_vm4, %v795_v39, %v402_v30  ;;  %v453_v37 = vsel %vm452_vm6, %v451_v34, %v449_v35 }
  0xb3   : > { %v455_v36 = vperm.slane %v406_v15, %v454_v22 }
  0xb5   : > { %v457_v29 = vsel %vm456_vm7, %v455_v36, %v453_v37 }
  0xba   : > { %v747_v5 = vpop.f32.mrf.mxu0 }
  0xc2   : > { %v270_v21 = vpop.f32.mrf.mxu0 }
 0x117   : > { %v411_v38 = vpop.permute.xlu1 %410 }
 0x118   : > { %v413_v40 = vmul.f32 %v411_v38, %v747_v5 }
 0x11a   : > { %v461_v41 = vmul.f32 %v457_v29, %v413_v40 }
 0x11c   : > { %463 = vst.msk [vmem:[%s194_s23] sm:$0x7] %vm462_vm8, %v461_v41 }
 0x11d PF: > { %s12_s11 = sadd.s32 1, %s653_s11   ;;  %s907_s9 = smov %s649_s10 }
 0x11e   : > { %p9_p5 = scmp.ge.s32.totalorder %s12_s11, 4   ;;  %s908_s10 = smov %s910_s12 }
 0x120   :  { %11 = sbr.rel (!%p9_p5) target bundleno = 2 (0x2), region = 65 }

</bundles_post_ra>
